<compile_context>
chip_gen: v7x
topology: tpu7x:2x2x1
jax: 0.10.0
libtpu: 0.0.40
codegen_flags: <defaults>
</compile_context>

<pallas_src>
import functools

import jax
import jax.numpy as jnp
from jax.experimental import pallas as pl
from jax.experimental.pallas import tpu as pltpu


def _round_up(x, m):
    return (x + m - 1) // m * m


def global_disc_kernel(v_ref, l_ref, w0v_ref, w0l_ref, b0_ref,
                       w1_ref, b1_ref, w2_ref, b2_ref, o_ref):
    # ---- layer 0: split "concat" matmul, f32 accumulation on the MXU --------
    h0 = jnp.dot(v_ref[...], w0v_ref[...], preferred_element_type=jnp.float32)
    h0 = h0 + jnp.dot(l_ref[...], w0l_ref[...], preferred_element_type=jnp.float32)
    h0 = jnp.maximum(h0 + b0_ref[...], 0.0)                      # bias + ReLU in f32

    # ---- layer 1: (TB,1024) @ (1024,512), bf16 inputs / f32 accumulate ------
    h1 = jnp.dot(h0.astype(w1_ref.dtype), w1_ref[...],
                 preferred_element_type=jnp.float32)
    h1 = jnp.maximum(h1 + b1_ref[...], 0.0)

    # ---- layer 2: N=1 output -> VPU mul + XLU lane reduction, not the MXU ---
    out = jnp.sum(h1 * w2_ref[...], axis=-1, keepdims=True) + b2_ref[...]
    o_ref[...] = out.astype(o_ref.dtype)


@functools.partial(jax.jit, static_argnames=("block_b",))
def global_discriminator(visual, language, params, *, block_b=512):
    """Forward pass of GlobalDiscriminator (batch-tiled Pallas kernel)."""
    w0, b0, w1, b1, w2, b2 = params
    B, Dv = visual.shape
    _, Dl = language.shape
    assert w0.shape[0] == Dv + Dl

    H0 = w0.shape[1]   # 1024
    H1 = w1.shape[1]   # 512

    # Split W0 so the concat never materializes.
    w0v, w0l = w0[:Dv], w0[Dv:]

    # Mixed precision: bf16 for the two big matmul operands, f32 elsewhere.
    v = visual.astype(jnp.bfloat16)
    l = language.astype(jnp.bfloat16)
    w0v = w0v.astype(jnp.bfloat16)
    w0l = w0l.astype(jnp.bfloat16)
    w1b = w1.astype(jnp.bfloat16)
    w2row = w2.reshape(1, H1)          # (1, 512) f32 row for the lane reduction

    # Zero-pad the contraction (K) dims to multiples of 128 (mathematically a no-op).
    def pad_axis(x, axis, mult=128):
        pad = (-x.shape[axis]) % mult
        if pad == 0:
            return x
        widths = [(0, 0)] * x.ndim
        widths[axis] = (0, pad)
        return jnp.pad(x, widths)

    v, w0v = pad_axis(v, 1), pad_axis(w0v, 0)
    l, w0l = pad_axis(l, 1), pad_axis(w0l, 0)
    Dv_p, Dl_p = v.shape[1], l.shape[1]

    # Batch tile: multiple of 8 sublanes, capped at block_b; pad B up to a multiple.
    tb = min(block_b, _round_up(B, 8))
    B_p = _round_up(B, tb)
    if B_p != B:
        v = jnp.pad(v, ((0, B_p - B), (0, 0)))
        l = jnp.pad(l, ((0, B_p - B), (0, 0)))

    # Weights/biases stay resident: same (0, 0) block for every grid step, so they
    # are fetched from HBM only once regardless of the number of batch tiles.
    # TODO(synk): pipeline_mode=pl.Buffered(1) on these constant-index blocks would
    # drop the redundant double buffer; not applied since VMEM is far from tight.
    resident = lambda shape: pl.BlockSpec(shape, lambda i: (0, 0))

    out = pl.pallas_call(
        global_disc_kernel,
        out_shape=jax.ShapeDtypeStruct((B_p, 1), jnp.float32),
        grid=(B_p // tb,),
        in_specs=[
            pl.BlockSpec((tb, Dv_p), lambda i: (i, 0)),   # visual tile   (bf16)
            pl.BlockSpec((tb, Dl_p), lambda i: (i, 0)),   # language tile (bf16)
            resident((Dv_p, H0)),                         # W0_v  (bf16)
            resident((Dl_p, H0)),                         # W0_l  (bf16)
            resident((1, H0)),                            # b0    (f32)
            resident((H0, H1)),                           # W1    (bf16)
            resident((1, H1)),                            # b1    (f32)
            resident((1, H1)),                            # W2 as row (f32)
            resident((1, 1)),                             # b2    (f32)
        ],
        out_specs=pl.BlockSpec((tb, 1), lambda i: (i, 0)),
        compiler_params=pltpu.CompilerParams(
            dimension_semantics=("parallel",),            # megacore sharding on v7x
            vmem_limit_bytes=32 * 1024 * 1024,            # safe on v5e/v6e/v7x
        ),
    )(v, l, w0v, w0l, b0, w1b, b1, w2row, b2)

    return out[:B]


def init_params(key, in_feature):
    """Synthetic nn.Linear-like params, stored transposed: W (in, out), b (1, out)."""
    dims = [(in_feature, 1024), (1024, 512), (512, 1)]
    params = []
    for din, dout in dims:
        kw, kb, key = jax.random.split(key, 3)
        bound = 1.0 / jnp.sqrt(din)
        w = jax.random.uniform(kw, (din, dout), jnp.float32, -bound, bound)
        b = jax.random.uniform(kb, (1, dout), jnp.float32, -bound, bound)
        params += [w, b]
    return tuple(params)


def reference_f32(visual, language, params):
    """Pure-f32 reference (exact PyTorch semantics)."""
    w0, b0, w1, b1, w2, b2 = params
    x = jnp.concatenate([visual, language], axis=-1)
    h = jax.nn.relu(x @ w0 + b0)
    h = jax.nn.relu(h @ w1 + b1)
    return h @ w2 + b2


def reference_mixed(visual, language, params):
    """Reference matching the kernel's bf16-input / f32-accumulate precision."""
    w0, b0, w1, b1, w2, b2 = params
    x = jnp.concatenate(
        [visual.astype(jnp.bfloat16), language.astype(jnp.bfloat16)], axis=-1)
    h = jnp.dot(x, w0.astype(jnp.bfloat16), preferred_element_type=jnp.float32) + b0
    h = jax.nn.relu(h)
    h = jnp.dot(h.astype(jnp.bfloat16), w1.astype(jnp.bfloat16),
                preferred_element_type=jnp.float32) + b1
    h = jax.nn.relu(h)
    return h @ w2 + b2


if __name__ == "__main__":
    key = jax.random.PRNGKey(0)
    k_v, k_l, k_p = jax.random.split(key, 3)

    B, Dv, Dl = 8, 32, 32                       # in_feature = 64
    visual = jax.random.normal(k_v, (B, Dv), jnp.float32)
    language = jax.random.normal(k_l, (B, Dl), jnp.float32)
    params = init_params(k_p, Dv + Dl)

    out = global_discriminator(visual, language, params)
    out = jax.block_until_ready(out)
    assert out.shape == (B, 1)

    # Tight check vs a precision-matched reference (bf16 in / f32 accumulate).
    ref_m = reference_mixed(visual, language, params)
    assert jnp.allclose(out, ref_m, atol=2e-3, rtol=2e-3), \
        f"mixed-ref mismatch: {jnp.max(jnp.abs(out - ref_m))}"

    # Loose sanity check vs the exact f32 module semantics.
    ref_f = reference_f32(visual, language, params)
    assert jnp.allclose(out, ref_f, atol=5e-2, rtol=5e-2), \
        f"f32-ref mismatch: {jnp.max(jnp.abs(out - ref_f))}"

    print("KERNEL_OK")
</pallas_src>

<mosaic_0001>
module attributes {stable_mosaic.version = 11 : i64} {
  func.func @global_disc_kernel(%arg0: i32, %arg1: memref<8x128xbf16, #tpu.memory_space<vmem>>, %arg2: memref<8x128xbf16, #tpu.memory_space<vmem>>, %arg3: memref<128x1024xbf16, #tpu.memory_space<vmem>>, %arg4: memref<128x1024xbf16, #tpu.memory_space<vmem>>, %arg5: memref<1x1024xf32, #tpu.memory_space<vmem>>, %arg6: memref<1024x512xbf16, #tpu.memory_space<vmem>>, %arg7: memref<1x512xf32, #tpu.memory_space<vmem>>, %arg8: memref<1x512xf32, #tpu.memory_space<vmem>>, %arg9: memref<1x1xf32, #tpu.memory_space<vmem>>, %arg10: memref<8x1xf32, #tpu.memory_space<vmem>>) attributes {dimension_semantics = [#tpu.dimension_semantics<parallel>], iteration_bounds = array<i64: 1>, scalar_prefetch = 0 : i64, scratch_operands = 0 : i64, tpu.core_type = #tpu.core_type<tc>, window_params = [{transform_indices = @transform_0, window_bounds = array<i64: 8, 128>}, {transform_indices = @transform_1, window_bounds = array<i64: 8, 128>}, {pipeline_mode = #tpu.pipeline_mode<synchronous>, transform_indices = @transform_2, window_bounds = array<i64: 128, 1024>}, {pipeline_mode = #tpu.pipeline_mode<synchronous>, transform_indices = @transform_3, window_bounds = array<i64: 128, 1024>}, {pipeline_mode = #tpu.pipeline_mode<synchronous>, transform_indices = @transform_4, window_bounds = array<i64: 1, 1024>}, {pipeline_mode = #tpu.pipeline_mode<synchronous>, transform_indices = @transform_5, window_bounds = array<i64: 1024, 512>}, {pipeline_mode = #tpu.pipeline_mode<synchronous>, transform_indices = @transform_6, window_bounds = array<i64: 1, 512>}, {pipeline_mode = #tpu.pipeline_mode<synchronous>, transform_indices = @transform_7, window_bounds = array<i64: 1, 512>}, {pipeline_mode = #tpu.pipeline_mode<synchronous>, transform_indices = @transform_8, window_bounds = array<i64: 1, 1>}, {transform_indices = @transform_9, window_bounds = array<i64: 8, 1>}]} {
    %c0 = arith.constant 0 : index
    %c0_0 = arith.constant 0 : index
    %0 = vector.load %arg1[%c0, %c0_0] : memref<8x128xbf16, #tpu.memory_space<vmem>>, vector<8x128xbf16>
    %c0_1 = arith.constant 0 : index
    %c0_2 = arith.constant 0 : index
    %1 = vector.load %arg3[%c0_1, %c0_2] : memref<128x1024xbf16, #tpu.memory_space<vmem>>, vector<128x1024xbf16>
    %cst = arith.constant dense<0.000000e+00> : vector<8x1024xf32>
    %2 = tpu.matmul %0, %1, %cst {dimension_numbers = #tpu.dot_dimension_numbers<[1], [0], [0], [1], [0, 0, 1, 1], [], []>} : vector<8x128xbf16>, vector<128x1024xbf16>, vector<8x1024xf32> -> vector<8x1024xf32>
    %c0_3 = arith.constant 0 : index
    %c0_4 = arith.constant 0 : index
    %3 = vector.load %arg2[%c0_3, %c0_4] : memref<8x128xbf16, #tpu.memory_space<vmem>>, vector<8x128xbf16>
    %c0_5 = arith.constant 0 : index
    %c0_6 = arith.constant 0 : index
    %4 = vector.load %arg4[%c0_5, %c0_6] : memref<128x1024xbf16, #tpu.memory_space<vmem>>, vector<128x1024xbf16>
    %cst_7 = arith.constant dense<0.000000e+00> : vector<8x1024xf32>
    %5 = tpu.matmul %3, %4, %cst_7 {dimension_numbers = #tpu.dot_dimension_numbers<[1], [0], [0], [1], [0, 0, 1, 1], [], []>} : vector<8x128xbf16>, vector<128x1024xbf16>, vector<8x1024xf32> -> vector<8x1024xf32>
    %6 = arith.addf %2, %5 : vector<8x1024xf32>
    %c0_8 = arith.constant 0 : index
    %c0_9 = arith.constant 0 : index
    %7 = vector.load %arg5[%c0_8, %c0_9] : memref<1x1024xf32, #tpu.memory_space<vmem>>, vector<1x1024xf32>
    %8 = vector.broadcast %7 : vector<1x1024xf32> to vector<8x1024xf32>
    %9 = arith.addf %6, %8 : vector<8x1024xf32>
    %cst_10 = arith.constant 0.000000e+00 : f32
    %10 = vector.broadcast %cst_10 : f32 to vector<8x1024xf32>
    %11 = arith.maximumf %9, %10 : vector<8x1024xf32>
    %12 = arith.truncf %11 : vector<8x1024xf32> to vector<8x1024xbf16>
    %c0_11 = arith.constant 0 : index
    %c0_12 = arith.constant 0 : index
    %13 = vector.load %arg6[%c0_11, %c0_12] : memref<1024x512xbf16, #tpu.memory_space<vmem>>, vector<1024x512xbf16>
    %cst_13 = arith.constant dense<0.000000e+00> : vector<8x512xf32>
    %14 = tpu.matmul %12, %13, %cst_13 {dimension_numbers = #tpu.dot_dimension_numbers<[1], [0], [0], [1], [0, 0, 1, 1], [], []>} : vector<8x1024xbf16>, vector<1024x512xbf16>, vector<8x512xf32> -> vector<8x512xf32>
    %c0_14 = arith.constant 0 : index
    %c0_15 = arith.constant 0 : index
    %15 = vector.load %arg7[%c0_14, %c0_15] : memref<1x512xf32, #tpu.memory_space<vmem>>, vector<1x512xf32>
    %16 = vector.broadcast %15 : vector<1x512xf32> to vector<8x512xf32>
    %17 = arith.addf %14, %16 : vector<8x512xf32>
    %cst_16 = arith.constant 0.000000e+00 : f32
    %18 = vector.broadcast %cst_16 : f32 to vector<8x512xf32>
    %19 = arith.maximumf %17, %18 : vector<8x512xf32>
    %c0_17 = arith.constant 0 : index
    %c0_18 = arith.constant 0 : index
    %20 = vector.load %arg8[%c0_17, %c0_18] : memref<1x512xf32, #tpu.memory_space<vmem>>, vector<1x512xf32>
    %21 = vector.broadcast %20 : vector<1x512xf32> to vector<8x512xf32>
    %22 = arith.mulf %19, %21 : vector<8x512xf32>
    %cst_19 = arith.constant dense<0.000000e+00> : vector<8xf32>
    %23 = vector.multi_reduction <add>, %22, %cst_19 [1] : vector<8x512xf32> to vector<8xf32>
    %24 = vector.shape_cast %23 : vector<8xf32> to vector<8x1xf32>
    %c0_20 = arith.constant 0 : index
    %c0_21 = arith.constant 0 : index
    %25 = vector.load %arg9[%c0_20, %c0_21] : memref<1x1xf32, #tpu.memory_space<vmem>>, vector<1x1xf32>
    %26 = vector.broadcast %25 : vector<1x1xf32> to vector<8x1xf32>
    %27 = arith.addf %24, %26 : vector<8x1xf32>
    %c0_22 = arith.constant 0 : index
    %c0_23 = arith.constant 0 : index
    %28 = vector.load %arg10[%c0_22, %c0_23] : memref<8x1xf32, #tpu.memory_space<vmem>>, vector<8x1xf32>
    tpu.vector_store %arg10[%c0_22, %c0_23], %27 {strides = array<i32>} : memref<8x1xf32, #tpu.memory_space<vmem>>, vector<8x1xf32>,
    return
  }
  func.func @transform_0(%arg0: i32) -> (i32, i32) {
    %c0_i32 = arith.constant 0 : i32
    %c0_i32_0 = arith.constant 0 : i32
    return %arg0, %c0_i32 : i32, i32
  }
  func.func @transform_1(%arg0: i32) -> (i32, i32) {
    %c0_i32 = arith.constant 0 : i32
    %c0_i32_0 = arith.constant 0 : i32
    return %arg0, %c0_i32 : i32, i32
  }
  func.func @transform_2(%arg0: i32) -> (i32, i32) {
    %c0_i32 = arith.constant 0 : i32
    %c0_i32_0 = arith.constant 0 : i32
    %c0_i32_1 = arith.constant 0 : i32
    return %c0_i32, %c0_i32_0 : i32, i32
  }
  func.func @transform_3(%arg0: i32) -> (i32, i32) {
    %c0_i32 = arith.constant 0 : i32
    %c0_i32_0 = arith.constant 0 : i32
    %c0_i32_1 = arith.constant 0 : i32
    return %c0_i32, %c0_i32_0 : i32, i32
  }
  func.func @transform_4(%arg0: i32) -> (i32, i32) {
    %c0_i32 = arith.constant 0 : i32
    %c0_i32_0 = arith.constant 0 : i32
    %c0_i32_1 = arith.constant 0 : i32
    return %c0_i32, %c0_i32_0 : i32, i32
  }
  func.func @transform_5(%arg0: i32) -> (i32, i32) {
    %c0_i32 = arith.constant 0 : i32
    %c0_i32_0 = arith.constant 0 : i32
    %c0_i32_1 = arith.constant 0 : i32
    return %c0_i32, %c0_i32_0 : i32, i32
  }
  func.func @transform_6(%arg0: i32) -> (i32, i32) {
    %c0_i32 = arith.constant 0 : i32
    %c0_i32_0 = arith.constant 0 : i32
    %c0_i32_1 = arith.constant 0 : i32
    return %c0_i32, %c0_i32_0 : i32, i32
  }
  func.func @transform_7(%arg0: i32) -> (i32, i32) {
    %c0_i32 = arith.constant 0 : i32
    %c0_i32_0 = arith.constant 0 : i32
    %c0_i32_1 = arith.constant 0 : i32
    return %c0_i32, %c0_i32_0 : i32, i32
  }
  func.func @transform_8(%arg0: i32) -> (i32, i32) {
    %c0_i32 = arith.constant 0 : i32
    %c0_i32_0 = arith.constant 0 : i32
    %c0_i32_1 = arith.constant 0 : i32
    return %c0_i32, %c0_i32_0 : i32, i32
  }
  func.func @transform_9(%arg0: i32) -> (i32, i32) {
    %c0_i32 = arith.constant 0 : i32
    %c0_i32_0 = arith.constant 0 : i32
    return %arg0, %c0_i32 : i32, i32
  }
}

</mosaic_0001>

<bundles_post_ra>
// kernel: global_discriminator.1
= control target key start
LH: loop header
LB: loop body
LE: loop exit
PB: predicated region body
PF: predicated region fallthrough
CT: control target
= control target key end

     0   :  { %v3932_v3 = vmov 0   ;;  %vm3128_vm0 = vcmask 7168   ;;  %s5235_s3 = inlined_call_operand.vmem [shape: bf16[128,1024], index: 3, kind: input, shape index: {}]   ;;  %s5236_s1 = inlined_call_operand.vmem [shape: bf16[8,128], index: 1, kind: input, shape index: {}]   ;;  %s5237_s2 = inlined_call_operand.vmem [shape: bf16[128,1024], index: 2, kind: input, shape index: {}]   ;;  %s5238_s0 = inlined_call_operand.vmem [shape: bf16[8,128], index: 0, kind: input, shape index: {}]   ;;  %s5239_s5 = inlined_call_operand.vmem [shape: bf16[1024,512], index: 5, kind: input, shape index: {}]   ;;  %s5240_s4 = inlined_call_operand.vmem [shape: f32[1,1024], index: 4, kind: input, shape index: {}]   ;;  %s5241_s8 = inlined_call_operand.<no memory space> [shape: f32[1,1], index: 8, kind: input, shape index: {}]   ;;  %s5242_s6 = inlined_call_operand.vmem [shape: f32[1,512], index: 6, kind: input, shape index: {}]   ;;  %s5243_s7 = inlined_call_operand.vmem [shape: f32[1,512], index: 7, kind: input, shape index: {}]   ;;  %s5244_s9 = inlined_call_operand.vmem [shape: f32[8,1], index: 9, kind: output, shape index: {}]  }
   0x1   :  { %v101_v0 = vld [vmem:[%s5235_s3] sm:$0xff]  ;;  %v102_v2 = vld [vmem:[%s5235_s3 + $0x8] sm:$0xff]  ;;  %517 = vmatprep.mubr.bf16.mxu0 %v3932_v3  ;;  %558 = vmatprep.mubr.bf16.mxu1 %v3932_v3  ;;  %v103_v63 = vld [vmem:[%s5235_s3 + $0x10] sm:$0xff] }
   0x2   :  { %v105_v1 = vld [vmem:[%s5235_s3 + $0x20] sm:$0xff]  ;;  %v106_v5 = vld [vmem:[%s5235_s3 + $0x28] sm:$0xff] }
   0x3   :  { %v3135_v4 = vcombine.high %v101_v0, %v105_v1  ;;  %v3134_v6 = vcombine.low %v101_v0, %v105_v1  ;;  %v109_v7 = vld [vmem:[%s5235_s3 + $0x40] sm:$0xff]  ;;  %v3137_v9 = vcombine.high %v102_v2, %v106_v5  ;;  %v3136_v10 = vcombine.low %v102_v2, %v106_v5  ;;  %v110_v12 = vld [vmem:[%s5235_s3 + $0x48] sm:$0xff]  ;;  %v107_v0 = vld [vmem:[%s5235_s3 + $0x30] sm:$0xff] }
   0x4   :  { %v113_v8 = vld [vmem:[%s5235_s3 + $0x60] sm:$0xff]  ;;  %v114_v13 = vld [vmem:[%s5235_s3 + $0x68] sm:$0xff]  ;;  %v104_v1 = vld [vmem:[%s5235_s3 + $0x18] sm:$0xff] }
   0x5   :  { %v3143_v11 = vcombine.high %v109_v7, %v113_v8  ;;  %v117_v14 = vld [vmem:[%s5235_s3 + $0x80] sm:$0xff]  ;;  %485 = vmatprep.subr.bf16.mxu0 %v3135_v4  ;;  %v3145_v15 = vcombine.high %v110_v12, %v114_v13  ;;  %v118_v17 = vld [vmem:[%s5235_s3 + $0x88] sm:$0xff]  ;;  %526 = vmatprep.subr.bf16.mxu1 %v3137_v9  ;;  %v3142_v19 = vcombine.low %v109_v7, %v113_v8  ;;  %v108_v2 = vld [vmem:[%s5235_s3 + $0x38] sm:$0xff] }
   0x6   :  { %v121_v16 = vld [vmem:[%s5235_s3 + $0xa0] sm:$0xff]  ;;  %v122_v18 = vld [vmem:[%s5235_s3 + $0xa8] sm:$0xff]  ;;  %486 = vmatpush1.bf16.msra.mxu0 %v3134_v6  ;;  %527 = vmatpush1.bf16.msra.mxu1 %v3136_v10  ;;  %v3144_v20 = vcombine.low %v110_v12, %v114_v13  ;;  %v3139_v6 = vcombine.high %v103_v63, %v107_v0  ;;  %v3141_v7 = vcombine.high %v104_v1, %v108_v2  ;;  %v111_v8 = vld [vmem:[%s5235_s3 + $0x50] sm:$0xff] }
   0x7   :  { %487 = vmatprep.subr.bf16.mxu0 %v3143_v11  ;;  %v3151_v21 = vcombine.high %v117_v14, %v121_v16  ;;  %528 = vmatprep.subr.bf16.mxu1 %v3145_v15  ;;  %v3153_v22 = vcombine.high %v118_v17, %v122_v18  ;;  %v125_v23 = vld [vmem:[%s5235_s3 + $0xc0] sm:$0xff]  ;;  %v126_v25 = vld [vmem:[%s5235_s3 + $0xc8] sm:$0xff]  ;;  %v3150_v27 = vcombine.low %v117_v14, %v121_v16  ;;  %v115_v9 = vld [vmem:[%s5235_s3 + $0x70] sm:$0xff] }
   0x8   :  { %v129_v24 = vld [vmem:[%s5235_s3 + $0xe0] sm:$0xff]  ;;  %v130_v26 = vld [vmem:[%s5235_s3 + $0xe8] sm:$0xff]  ;;  %v3152_v28 = vcombine.low %v118_v17, %v122_v18  ;;  %v112_v10 = vld [vmem:[%s5235_s3 + $0x58] sm:$0xff]  ;;  %v3138_v13 = vcombine.low %v103_v63, %v107_v0  ;;  %v3140_v14 = vcombine.low %v104_v1, %v108_v2  ;;  %v3147_v15 = vcombine.high %v111_v8, %v115_v9 }
   0x9   :  { %v3159_v29 = vcombine.high %v125_v23, %v129_v24  ;;  %v3161_v30 = vcombine.high %v126_v25, %v130_v26  ;;  %v133_v31 = vld [vmem:[%s5235_s3 + $0x100] sm:$0xff]  ;;  %v134_v33 = vld [vmem:[%s5235_s3 + $0x108] sm:$0xff]  ;;  %v3158_v35 = vcombine.low %v125_v23, %v129_v24  ;;  %v3160_v36 = vcombine.low %v126_v25, %v130_v26  ;;  %v116_v11 = vld [vmem:[%s5235_s3 + $0x78] sm:$0xff] }
   0xa   :  { %488 = vmatpush1.bf16.msra.mxu0 %v3142_v19  ;;  %529 = vmatpush1.bf16.msra.mxu1 %v3144_v20  ;;  %v137_v32 = vld [vmem:[%s5235_s3 + $0x120] sm:$0xff]  ;;  %v138_v34 = vld [vmem:[%s5235_s3 + $0x128] sm:$0xff]  ;;  %v3149_v16 = vcombine.high %v112_v10, %v116_v11  ;;  %v119_v17 = vld [vmem:[%s5235_s3 + $0x90] sm:$0xff] }
   0xb   :  { %489 = vmatprep.subr.bf16.mxu0 %v3151_v21  ;;  %530 = vmatprep.subr.bf16.mxu1 %v3153_v22  ;;  %v3167_v37 = vcombine.high %v133_v31, %v137_v32  ;;  %v3169_v38 = vcombine.high %v134_v33, %v138_v34  ;;  %v141_v39 = vld [vmem:[%s5235_s3 + $0x140] sm:$0xff]  ;;  %v142_v41 = vld [vmem:[%s5235_s3 + $0x148] sm:$0xff]  ;;  %v3166_v43 = vcombine.low %v133_v31, %v137_v32  ;;  %v123_v18 = vld [vmem:[%s5235_s3 + $0xb0] sm:$0xff] }
   0xc   :  { %v145_v40 = vld [vmem:[%s5235_s3 + $0x160] sm:$0xff]  ;;  %v146_v42 = vld [vmem:[%s5235_s3 + $0x168] sm:$0xff]  ;;  %v3168_v44 = vcombine.low %v134_v33, %v138_v34  ;;  %v120_v19 = vld [vmem:[%s5235_s3 + $0x98] sm:$0xff]  ;;  %v3146_v21 = vcombine.low %v111_v8, %v115_v9  ;;  %v3148_v22 = vcombine.low %v112_v10, %v116_v11  ;;  %v3155_v23 = vcombine.high %v119_v17, %v123_v18 }
   0xd   :  { %v3175_v45 = vcombine.high %v141_v39, %v145_v40  ;;  %v3177_v46 = vcombine.high %v142_v41, %v146_v42  ;;  %v149_v47 = vld [vmem:[%s5235_s3 + $0x180] sm:$0xff]  ;;  %v150_v49 = vld [vmem:[%s5235_s3 + $0x188] sm:$0xff]  ;;  %v3174_v51 = vcombine.low %v141_v39, %v145_v40  ;;  %v3176_v52 = vcombine.low %v142_v41, %v146_v42  ;;  %v124_v20 = vld [vmem:[%s5235_s3 + $0xb8] sm:$0xff] }
   0xe   :  { %490 = vmatpush1.bf16.msra.mxu0 %v3150_v27  ;;  %531 = vmatpush1.bf16.msra.mxu1 %v3152_v28  ;;  %v153_v48 = vld [vmem:[%s5235_s3 + $0x1a0] sm:$0xff]  ;;  %v154_v50 = vld [vmem:[%s5235_s3 + $0x1a8] sm:$0xff]  ;;  %v3157_v24 = vcombine.high %v120_v19, %v124_v20  ;;  %v127_v25 = vld [vmem:[%s5235_s3 + $0xd0] sm:$0xff] }
   0xf   :  { %491 = vmatprep.subr.bf16.mxu0 %v3159_v29  ;;  %532 = vmatprep.subr.bf16.mxu1 %v3161_v30  ;;  %v3183_v53 = vcombine.high %v149_v47, %v153_v48  ;;  %v3185_v54 = vcombine.high %v150_v49, %v154_v50  ;;  %v157_v55 = vld [vmem:[%s5235_s3 + $0x1c0] sm:$0xff]  ;;  %v158_v57 = vld [vmem:[%s5235_s3 + $0x1c8] sm:$0xff]  ;;  %v3182_v59 = vcombine.low %v149_v47, %v153_v48  ;;  %v131_v26 = vld [vmem:[%s5235_s3 + $0xf0] sm:$0xff] }
  0x10   :  { %v161_v56 = vld [vmem:[%s5235_s3 + $0x1e0] sm:$0xff]  ;;  %v162_v58 = vld [vmem:[%s5235_s3 + $0x1e8] sm:$0xff]  ;;  %v3184_v60 = vcombine.low %v150_v49, %v154_v50  ;;  %v128_v27 = vld [vmem:[%s5235_s3 + $0xd8] sm:$0xff]  ;;  %v3154_v29 = vcombine.low %v119_v17, %v123_v18  ;;  %v3156_v30 = vcombine.low %v120_v19, %v124_v20  ;;  %v3163_v31 = vcombine.high %v127_v25, %v131_v26 }
  0x11   :  { %v3191_v61 = vcombine.high %v157_v55, %v161_v56  ;;  %v3193_v62 = vcombine.high %v158_v57, %v162_v58  ;;  %v3190_v4 = vcombine.low %v157_v55, %v161_v56  ;;  %v3192_v5 = vcombine.low %v158_v57, %v162_v58  ;;  %v4108_v12 = vld [vmem:[%s5236_s1] sm:$0xf]  ;;  %v132_v28 = vld [vmem:[%s5235_s3 + $0xf8] sm:$0xff]  ;;  %v135_v33 = vld [vmem:[%s5235_s3 + $0x110] sm:$0xff] }
  0x12   :  { %492 = vmatpush1.bf16.msra.mxu0 %v3158_v35  ;;  %533 = vmatpush1.bf16.msra.mxu1 %v3160_v36  ;;  %v3165_v32 = vcombine.high %v128_v27, %v132_v28  ;;  %v139_v34 = vld [vmem:[%s5235_s3 + $0x130] sm:$0xff]  ;;  %v136_v35 = vld [vmem:[%s5235_s3 + $0x118] sm:$0xff]  ;;  %v36_v1 = vld [vmem:[%s5237_s2] sm:$0xff] }
  0x13   :  { %493 = vmatprep.subr.bf16.mxu0 %v3167_v37  ;;  %534 = vmatprep.subr.bf16.mxu1 %v3169_v38  ;;  %v140_v36 = vld [vmem:[%s5235_s3 + $0x138] sm:$0xff]  ;;  %v3162_v37 = vcombine.low %v127_v25, %v131_v26  ;;  %v3164_v38 = vcombine.low %v128_v27, %v132_v28  ;;  %v3171_v39 = vcombine.high %v135_v33, %v139_v34  ;;  %v143_v41 = vld [vmem:[%s5235_s3 + $0x150] sm:$0xff]  ;;  %v40_v2 = vld [vmem:[%s5237_s2 + $0x20] sm:$0xff] }
  0x14   :  { %v3173_v40 = vcombine.high %v136_v35, %v140_v36  ;;  %v147_v42 = vld [vmem:[%s5235_s3 + $0x170] sm:$0xff]  ;;  %v3199_v8 = vcombine.high %v36_v1, %v40_v2  ;;  %v44_v10 = vld [vmem:[%s5237_s2 + $0x40] sm:$0xff] }
  0x15   :  { %v3179_v47 = vcombine.high %v143_v41, %v147_v42  ;;  %v151_v49 = vld [vmem:[%s5235_s3 + $0x190] sm:$0xff]  ;;  %v48_v11 = vld [vmem:[%s5237_s2 + $0x60] sm:$0xff] }
  0x16   :  { %494 = vmatpush1.bf16.msra.mxu0 %v3166_v43  ;;  %535 = vmatpush1.bf16.msra.mxu1 %v3168_v44  ;;  %v144_v43 = vld [vmem:[%s5235_s3 + $0x158] sm:$0xff]  ;;  %v155_v50 = vld [vmem:[%s5235_s3 + $0x1b0] sm:$0xff]  ;;  %v3207_v17 = vcombine.high %v44_v10, %v48_v11  ;;  %v52_v19 = vld [vmem:[%s5237_s2 + $0x80] sm:$0xff] }
  0x17   :  { %495 = vmatprep.subr.bf16.mxu0 %v3175_v45  ;;  %536 = vmatprep.subr.bf16.mxu1 %v3177_v46  ;;  %v148_v44 = vld [vmem:[%s5235_s3 + $0x178] sm:$0xff]  ;;  %v3170_v45 = vcombine.low %v135_v33, %v139_v34  ;;  %v3172_v46 = vcombine.low %v136_v35, %v140_v36  ;;  %v3187_v55 = vcombine.high %v151_v49, %v155_v50  ;;  %v159_v57 = vld [vmem:[%s5235_s3 + $0x1d0] sm:$0xff]  ;;  %v56_v20 = vld [vmem:[%s5237_s2 + $0xa0] sm:$0xff] }
  0x18   :  { %v3181_v48 = vcombine.high %v144_v43, %v148_v44  ;;  %v163_v58 = vld [vmem:[%s5235_s3 + $0x1f0] sm:$0xff]  ;;  %v3215_v25 = vcombine.high %v52_v19, %v56_v20  ;;  %v60_v27 = vld [vmem:[%s5237_s2 + $0xc0] sm:$0xff]  ;;  %v69_v36 = vld [vmem:[%s5237_s2 + $0x108] sm:$0xff] }
  0x19   :  { %v3195_v63 = vcombine.high %v159_v57, %v163_v58  ;;  %v64_v28 = vld [vmem:[%s5237_s2 + $0xe0] sm:$0xff] }
  0x1a   :  { %496 = vmatpush1.bf16.msra.mxu0 %v3174_v51  ;;  %537 = vmatpush1.bf16.msra.mxu1 %v3176_v52  ;;  %v152_v51 = vld [vmem:[%s5235_s3 + $0x198] sm:$0xff]  ;;  %v68_v34 = vld [vmem:[%s5237_s2 + $0x100] sm:$0xff] }
  0x1b   :  { %497 = vmatprep.subr.bf16.mxu0 %v3183_v53  ;;  %538 = vmatprep.subr.bf16.mxu1 %v3185_v54  ;;  %v156_v52 = vld [vmem:[%s5235_s3 + $0x1b8] sm:$0xff]  ;;  %v3178_v53 = vcombine.low %v143_v41, %v147_v42  ;;  %v3180_v54 = vcombine.low %v144_v43, %v148_v44  ;;  %v72_v35 = vld [vmem:[%s5237_s2 + $0x120] sm:$0xff]  ;;  %v77_v44 = vld [vmem:[%s5237_s2 + $0x148] sm:$0xff] }
  0x1c   :  { %v3189_v56 = vcombine.high %v152_v51, %v156_v52  ;;  %v76_v42 = vld [vmem:[%s5237_s2 + $0x140] sm:$0xff] }
  0x1d   :  { %v80_v43 = vld [vmem:[%s5237_s2 + $0x160] sm:$0xff] }
  0x1e   :  { %498 = vmatpush1.bf16.msra.mxu0 %v3182_v59  ;;  %539 = vmatpush1.bf16.msra.mxu1 %v3184_v60  ;;  %v160_v59 = vld [vmem:[%s5235_s3 + $0x1d8] sm:$0xff] }
  0x1f   :  { %499 = vmatprep.subr.bf16.mxu0 %v3191_v61  ;;  %540 = vmatprep.subr.bf16.mxu1 %v3193_v62  ;;  %v164_v60 = vld [vmem:[%s5235_s3 + $0x1f8] sm:$0xff]  ;;  %v3186_v61 = vcombine.low %v151_v49, %v155_v50  ;;  %v3188_v62 = vcombine.low %v152_v51, %v156_v52  ;;  %v84_v50 = vld [vmem:[%s5237_s2 + $0x180] sm:$0xff]  ;;  %v85_v52 = vld [vmem:[%s5237_s2 + $0x188] sm:$0xff] }
  0x20   :  { %v3197_v0 = vcombine.high %v160_v59, %v164_v60  ;;  %v88_v51 = vld [vmem:[%s5237_s2 + $0x1a0] sm:$0xff] }
  0x22   :  { %500 = vmatpush1.bf16.msra.mxu0 %v3190_v4  ;;  %541 = vmatpush1.bf16.msra.mxu1 %v3192_v5  ;;  %v37_v4 = vld [vmem:[%s5237_s2 + $0x8] sm:$0xff] }
  0x23   :  { %567 = vmatprep.subr.bf16.mxu0 %v3139_v6  ;;  %608 = vmatprep.subr.bf16.mxu1 %v3141_v7  ;;  %v41_v5 = vld [vmem:[%s5237_s2 + $0x28] sm:$0xff]  ;;  %v3194_v6 = vcombine.low %v159_v57, %v163_v58  ;;  %v3196_v7 = vcombine.low %v160_v59, %v164_v60  ;;  %v92_v58 = vld [vmem:[%s5237_s2 + $0x1c0] sm:$0xff] }
  0x24   :  { %v3201_v9 = vcombine.high %v37_v4, %v41_v5  ;;  %v96_v59 = vld [vmem:[%s5237_s2 + $0x1e0] sm:$0xff]  ;;  %v93_v60 = vld [vmem:[%s5237_s2 + $0x1c8] sm:$0xff] }
  0x25   :  { %518 = vmatmul.mubr.bf16.vlgmr.msra.gmra.mrb[0].mxu0 %v4108_v12  ;;  %559 = vmatmul.mubr.bf16.vlgmr.msra.gmra.mrb[0].mxu1 %v4108_v12 }
  0x26   :  { %568 = vmatpush1.bf16.msra.mxu0 %v3138_v13  ;;  %609 = vmatpush1.bf16.msra.mxu1 %v3140_v14  ;;  %v45_v13 = vld [vmem:[%s5237_s2 + $0x48] sm:$0xff] }
  0x27   :  { %569 = vmatprep.subr.bf16.mxu0 %v3147_v15  ;;  %610 = vmatprep.subr.bf16.mxu1 %v3149_v16  ;;  %v49_v14 = vld [vmem:[%s5237_s2 + $0x68] sm:$0xff]  ;;  %v3198_v15 = vcombine.low %v36_v1, %v40_v2  ;;  %v3200_v16 = vcombine.low %v37_v4, %v41_v5  ;;  %v38_v2 = vld [vmem:[%s5237_s2 + $0x10] sm:$0xff]  ;;  %v39_v5 = vld [vmem:[%s5237_s2 + $0x18] sm:$0xff] }
  0x28   :  { %599 = vmatprep.mubr.bf16.mxu0 %v3932_v3  ;;  %640 = vmatprep.mubr.bf16.mxu1 %v3932_v3  ;;  %v3209_v18 = vcombine.high %v45_v13, %v49_v14  ;;  %v42_v4 = vld [vmem:[%s5237_s2 + $0x30] sm:$0xff] }
  0x2a   :  { %570 = vmatpush1.bf16.msra.mxu0 %v3146_v21  ;;  %611 = vmatpush1.bf16.msra.mxu1 %v3148_v22  ;;  %v53_v21 = vld [vmem:[%s5237_s2 + $0x88] sm:$0xff] }
  0x2b   :  { %571 = vmatprep.subr.bf16.mxu0 %v3155_v23  ;;  %612 = vmatprep.subr.bf16.mxu1 %v3157_v24  ;;  %v57_v22 = vld [vmem:[%s5237_s2 + $0xa8] sm:$0xff]  ;;  %v3206_v23 = vcombine.low %v44_v10, %v48_v11  ;;  %v3208_v24 = vcombine.low %v45_v13, %v49_v14  ;;  %v46_v11 = vld [vmem:[%s5237_s2 + $0x50] sm:$0xff]  ;;  %v47_v14 = vld [vmem:[%s5237_s2 + $0x58] sm:$0xff] }
  0x2c   :  { %v3217_v26 = vcombine.high %v53_v21, %v57_v22  ;;  %v50_v13 = vld [vmem:[%s5237_s2 + $0x70] sm:$0xff] }
  0x2e   :  { %572 = vmatpush1.bf16.msra.mxu0 %v3154_v29  ;;  %613 = vmatpush1.bf16.msra.mxu1 %v3156_v30  ;;  %v65_v29 = vld [vmem:[%s5237_s2 + $0xe8] sm:$0xff]  ;;  %v3214_v30 = vcombine.low %v52_v19, %v56_v20  ;;  %v3211_v19 = vcombine.high %v46_v11, %v50_v13 }
  0x2f   :  { %573 = vmatprep.subr.bf16.mxu0 %v3163_v31  ;;  %614 = vmatprep.subr.bf16.mxu1 %v3165_v32  ;;  %v3216_v31 = vcombine.low %v53_v21, %v57_v22  ;;  %v3223_v32 = vcombine.high %v60_v27, %v64_v28  ;;  %v54_v21 = vld [vmem:[%s5237_s2 + $0x90] sm:$0xff] }
  0x30   :  { %v58_v22 = vld [vmem:[%s5237_s2 + $0xb0] sm:$0xff] }
  0x32   :  { %574 = vmatpush1.bf16.msra.mxu0 %v3162_v37  ;;  %615 = vmatpush1.bf16.msra.mxu1 %v3164_v38  ;;  %v73_v37 = vld [vmem:[%s5237_s2 + $0x128] sm:$0xff]  ;;  %v3222_v38 = vcombine.low %v60_v27, %v64_v28  ;;  %v3219_v27 = vcombine.high %v54_v21, %v58_v22 }
  0x33   :  { %575 = vmatprep.subr.bf16.mxu0 %v3171_v39  ;;  %616 = vmatprep.subr.bf16.mxu1 %v3173_v40  ;;  %v3231_v40 = vcombine.high %v68_v34, %v72_v35  ;;  %v3233_v41 = vcombine.high %v69_v36, %v73_v37 }
  0x36   :  { %576 = vmatpush1.bf16.msra.mxu0 %v3170_v45  ;;  %617 = vmatpush1.bf16.msra.mxu1 %v3172_v46  ;;  %v81_v45 = vld [vmem:[%s5237_s2 + $0x168] sm:$0xff]  ;;  %v3230_v46 = vcombine.low %v68_v34, %v72_v35 }
  0x37   :  { %577 = vmatprep.subr.bf16.mxu0 %v3179_v47  ;;  %618 = vmatprep.subr.bf16.mxu1 %v3181_v48  ;;  %v3232_v47 = vcombine.low %v69_v36, %v73_v37  ;;  %v3239_v48 = vcombine.high %v76_v42, %v80_v43  ;;  %v3241_v49 = vcombine.high %v77_v44, %v81_v45  ;;  %v70_v36 = vld [vmem:[%s5237_s2 + $0x110] sm:$0xff] }
  0x38   :  { %v74_v37 = vld [vmem:[%s5237_s2 + $0x130] sm:$0xff] }
  0x3a   :  { %578 = vmatpush1.bf16.msra.mxu0 %v3178_v53  ;;  %619 = vmatpush1.bf16.msra.mxu1 %v3180_v54  ;;  %v89_v53 = vld [vmem:[%s5237_s2 + $0x1a8] sm:$0xff]  ;;  %v3238_v54 = vcombine.low %v76_v42, %v80_v43  ;;  %v78_v43 = vld [vmem:[%s5237_s2 + $0x150] sm:$0xff] }
  0x3b   :  { %579 = vmatprep.subr.bf16.mxu0 %v3187_v55  ;;  %620 = vmatprep.subr.bf16.mxu1 %v3189_v56  ;;  %v3240_v55 = vcombine.low %v77_v44, %v81_v45  ;;  %v3247_v56 = vcombine.high %v84_v50, %v88_v51  ;;  %v3249_v57 = vcombine.high %v85_v52, %v89_v53  ;;  %v82_v44 = vld [vmem:[%s5237_s2 + $0x170] sm:$0xff]  ;;  %v79_v45 = vld [vmem:[%s5237_s2 + $0x158] sm:$0xff] }
  0x3e   :  { %580 = vmatpush1.bf16.msra.mxu0 %v3186_v61  ;;  %621 = vmatpush1.bf16.msra.mxu1 %v3188_v62  ;;  %v97_v61 = vld [vmem:[%s5237_s2 + $0x1e8] sm:$0xff]  ;;  %v3246_v62 = vcombine.low %v84_v50, %v88_v51  ;;  %v86_v51 = vld [vmem:[%s5237_s2 + $0x190] sm:$0xff] }
  0x3f   :  { %581 = vmatprep.subr.bf16.mxu0 %v3195_v63  ;;  %622 = vmatprep.subr.bf16.mxu1 %v3197_v0  ;;  %v3248_v63 = vcombine.low %v85_v52, %v89_v53  ;;  %v3255_v0 = vcombine.high %v92_v58, %v96_v59  ;;  %v3257_v1 = vcombine.high %v93_v60, %v97_v61  ;;  %v90_v52 = vld [vmem:[%s5237_s2 + $0x1b0] sm:$0xff]  ;;  %v87_v53 = vld [vmem:[%s5237_s2 + $0x198] sm:$0xff] }
  0x42   :  { %582 = vmatpush1.bf16.msra.mxu0 %v3194_v6  ;;  %623 = vmatpush1.bf16.msra.mxu1 %v3196_v7  ;;  %v43_v6 = vld [vmem:[%s5237_s2 + $0x38] sm:$0xff]  ;;  %v3254_v7 = vcombine.low %v92_v58, %v96_v59  ;;  %v94_v59 = vld [vmem:[%s5237_s2 + $0x1d0] sm:$0xff] }
  0x43   :  { %969 = vmatprep.subr.bf16.mxu0 %v3199_v8  ;;  %1010 = vmatprep.subr.bf16.mxu1 %v3201_v9  ;;  %v3256_v8 = vcombine.low %v93_v60, %v97_v61  ;;  %v3203_v9 = vcombine.high %v38_v2, %v42_v4  ;;  %v3205_v10 = vcombine.high %v39_v5, %v43_v6  ;;  %v98_v60 = vld [vmem:[%s5237_s2 + $0x1f0] sm:$0xff]  ;;  %v95_v61 = vld [vmem:[%s5237_s2 + $0x1d8] sm:$0xff] }
  0x45   :  { %600 = vmatmul.mubr.bf16.vlgmr.msra.gmra.mrb[4].mxu0 %v4108_v12  ;;  %641 = vmatmul.mubr.bf16.vlgmr.msra.gmra.mrb[4].mxu1 %v4108_v12  ;;  %v61_v12 = vld [vmem:[%s5237_s2 + $0xc8] sm:$0xff] }
  0x46   :  { %970 = vmatpush1.bf16.msra.mxu0 %v3198_v15  ;;  %1011 = vmatpush1.bf16.msra.mxu1 %v3200_v16  ;;  %v3225_v33 = vcombine.high %v61_v12, %v65_v29  ;;  %v3224_v39 = vcombine.low %v61_v12, %v65_v29  ;;  %v51_v15 = vld [vmem:[%s5237_s2 + $0x78] sm:$0xff]  ;;  %v4313_v16 = vld [vmem:[%s5238_s0] sm:$0xf]  ;;  %v62_v12 = vld [vmem:[%s5237_s2 + $0xd0] sm:$0xff] }
  0x47   :  { %971 = vmatprep.subr.bf16.mxu0 %v3207_v17  ;;  %1012 = vmatprep.subr.bf16.mxu1 %v3209_v18  ;;  %v3202_v17 = vcombine.low %v38_v2, %v42_v4  ;;  %v3204_v18 = vcombine.low %v39_v5, %v43_v6  ;;  %v3213_v20 = vcombine.high %v47_v14, %v51_v15  ;;  %v66_v29 = vld [vmem:[%s5237_s2 + $0xf0] sm:$0xff] }
  0x48   :  { %1001 = vmatprep.mubr.bf16.mxu0 %v3932_v3  ;;  %1042 = vmatprep.mubr.bf16.mxu1 %v3932_v3  ;;  %v3227_v34 = vcombine.high %v62_v12, %v66_v29  ;;  %v3258_v4 = vcombine.low %v94_v59, %v98_v60  ;;  %v3550_v6 = vld [vmem:[%s5239_s5 + $0x4] ss:$16 sps:$4 sm:$0xff]  }
  0x4a   :  { %972 = vmatpush1.bf16.msra.mxu0 %v3206_v23  ;;  %1013 = vmatpush1.bf16.msra.mxu1 %v3208_v24  ;;  %v55_v23 = vld [vmem:[%s5237_s2 + $0x98] sm:$0xff] }
  0x4b   :  { %973 = vmatprep.subr.bf16.mxu0 %v3215_v25  ;;  %1014 = vmatprep.subr.bf16.mxu1 %v3217_v26  ;;  %v59_v24 = vld [vmem:[%s5237_s2 + $0xb8] sm:$0xff]  ;;  %v3210_v25 = vcombine.low %v46_v11, %v50_v13  ;;  %v3212_v26 = vcombine.low %v47_v14, %v51_v15  ;;  %v3554_v13 = vld [vmem:[%s5239_s5 + $0x20] ss:$16 sps:$4 sm:$0xff]   ;;  %v3562_v15 = vld [vmem:[%s5239_s5 + $0x44] ss:$16 sps:$4 sm:$0xff]  }
  0x4c   :  { %v3221_v28 = vcombine.high %v55_v23, %v59_v24  ;;  %v3559_v11 = vld [vmem:[%s5239_s5 + $0x2c] ss:$16 sps:$4 sm:$0xff]   ;;  %v3557_v14 = vld [vmem:[%s5239_s5 + $0x28] ss:$16 sps:$4 sm:$0xff]  }
  0x4e   :  { %974 = vmatpush1.bf16.msra.mxu0 %v3214_v30  ;;  %1015 = vmatpush1.bf16.msra.mxu1 %v3216_v31  ;;  %v63_v30 = vld [vmem:[%s5237_s2 + $0xd8] sm:$0xff] }
  0x4f   :  { %975 = vmatprep.subr.bf16.mxu0 %v3223_v32  ;;  %1016 = vmatprep.subr.bf16.mxu1 %v3225_v33  ;;  %v67_v31 = vld [vmem:[%s5237_s2 + $0xf8] sm:$0xff]  ;;  %v3218_v32 = vcombine.low %v54_v21, %v58_v22  ;;  %v3220_v33 = vcombine.low %v55_v23, %v59_v24  ;;  %v3566_v21 = vld [vmem:[%s5239_s5 + $0x60] ss:$16 sps:$4 sm:$0xff]   ;;  %v3574_v23 = vld [vmem:[%s5239_s5 + $0x84] ss:$16 sps:$4 sm:$0xff]  }
  0x50   :  { %v3229_v35 = vcombine.high %v63_v30, %v67_v31  ;;  %v3569_v22 = vld [vmem:[%s5239_s5 + $0x68] ss:$16 sps:$4 sm:$0xff]   ;;  %v3577_v24 = vld [vmem:[%s5239_s5 + $0x8c] ss:$16 sps:$4 sm:$0xff]  }
  0x52   :  { %976 = vmatpush1.bf16.msra.mxu0 %v3222_v38  ;;  %1017 = vmatpush1.bf16.msra.mxu1 %v3224_v39  ;;  %v75_v38 = vld [vmem:[%s5237_s2 + $0x138] sm:$0xff]  ;;  %v3226_v39 = vcombine.low %v62_v12, %v66_v29  ;;  %v3578_v12 = vld [vmem:[%s5239_s5 + $0xa0] ss:$16 sps:$4 sm:$0xff]  }
  0x53   :  { %977 = vmatprep.subr.bf16.mxu0 %v3231_v40  ;;  %1018 = vmatprep.subr.bf16.mxu1 %v3233_v41  ;;  %v3228_v40 = vcombine.low %v63_v30, %v67_v31  ;;  %v3235_v41 = vcombine.high %v70_v36, %v74_v37  ;;  %v3581_v29 = vld [vmem:[%s5239_s5 + $0xa8] ss:$16 sps:$4 sm:$0xff]   ;;  %v3586_v30 = vld [vmem:[%s5239_s5 + $0xc4] ss:$16 sps:$4 sm:$0xff]   ;;  %v3589_v31 = vld [vmem:[%s5239_s5 + $0xcc] ss:$16 sps:$4 sm:$0xff]  }
  0x56   :  { %978 = vmatpush1.bf16.msra.mxu0 %v3230_v46  ;;  %1019 = vmatpush1.bf16.msra.mxu1 %v3232_v47  ;;  %v83_v46 = vld [vmem:[%s5237_s2 + $0x178] sm:$0xff]  ;;  %v3234_v47 = vcombine.low %v70_v36, %v74_v37  ;;  %v3590_v36 = vld [vmem:[%s5239_s5 + $0xe0] ss:$16 sps:$4 sm:$0xff]  }
  0x57   :  { %979 = vmatprep.subr.bf16.mxu0 %v3239_v48  ;;  %1020 = vmatprep.subr.bf16.mxu1 %v3241_v49  ;;  %v3243_v49 = vcombine.high %v78_v43, %v82_v44  ;;  %v3245_v50 = vcombine.high %v79_v45, %v83_v46  ;;  %v3593_v37 = vld [vmem:[%s5239_s5 + $0xe8] ss:$16 sps:$4 sm:$0xff]  }
  0x5a   :  { %980 = vmatpush1.bf16.msra.mxu0 %v3238_v54  ;;  %1021 = vmatpush1.bf16.msra.mxu1 %v3240_v55  ;;  %v91_v54 = vld [vmem:[%s5237_s2 + $0x1b8] sm:$0xff]  ;;  %v3242_v55 = vcombine.low %v78_v43, %v82_v44 }
  0x5b   :  { %981 = vmatprep.subr.bf16.mxu0 %v3247_v56  ;;  %1022 = vmatprep.subr.bf16.mxu1 %v3249_v57  ;;  %v3244_v56 = vcombine.low %v79_v45, %v83_v46  ;;  %v3251_v57 = vcombine.high %v86_v51, %v90_v52  ;;  %v3253_v58 = vcombine.high %v87_v53, %v91_v54  ;;  %v3607_v43 = vld [vmem:[%s5239_s5 + $0x12c] ss:$16 sps:$4 sm:$0xff]   ;;  %v3605_v44 = vld [vmem:[%s5239_s5 + $0x128] ss:$16 sps:$4 sm:$0xff]   ;;  %v3610_v45 = vld [vmem:[%s5239_s5 + $0x144] ss:$16 sps:$4 sm:$0xff]  }
  0x5c   :  { %v3613_v46 = vld [vmem:[%s5239_s5 + $0x14c] ss:$16 sps:$4 sm:$0xff]  }
  0x5e   :  { %982 = vmatpush1.bf16.msra.mxu0 %v3246_v62  ;;  %1023 = vmatpush1.bf16.msra.mxu1 %v3248_v63  ;;  %v99_v62 = vld [vmem:[%s5237_s2 + $0x1f8] sm:$0xff]  ;;  %v3250_v63 = vcombine.low %v86_v51, %v90_v52  ;;  %v3614_v51 = vld [vmem:[%s5239_s5 + $0x160] ss:$16 sps:$4 sm:$0xff]  }
  0x5f   :  { %983 = vmatprep.subr.bf16.mxu0 %v3255_v0  ;;  %1024 = vmatprep.subr.bf16.mxu1 %v3257_v1  ;;  %v3252_v0 = vcombine.low %v87_v53, %v91_v54  ;;  %v3259_v1 = vcombine.high %v94_v59, %v98_v60  ;;  %v3261_v2 = vcombine.high %v95_v61, %v99_v62  ;;  %v3617_v52 = vld [vmem:[%s5239_s5 + $0x168] ss:$16 sps:$4 sm:$0xff]   ;;  %v3622_v53 = vld [vmem:[%s5239_s5 + $0x184] ss:$16 sps:$4 sm:$0xff]   ;;  %v3625_v54 = vld [vmem:[%s5239_s5 + $0x18c] ss:$16 sps:$4 sm:$0xff]  }
  0x60   :  { %v3260_v5 = vcombine.low %v95_v61, %v99_v62  ;;  %v3626_v59 = vld [vmem:[%s5239_s5 + $0x1a0] ss:$16 sps:$4 sm:$0xff]   ;;  %v3629_v60 = vld [vmem:[%s5239_s5 + $0x1a8] ss:$16 sps:$4 sm:$0xff]   ;;  %v3634_v61 = vld [vmem:[%s5239_s5 + $0x1c4] ss:$16 sps:$4 sm:$0xff]  }
  0x61   :  { %v3632_v62 = vld [vmem:[%s5239_s5 + $0x1c0] ss:$16 sps:$4 sm:$0xff]  }
  0x62   :  { %984 = vmatpush1.bf16.msra.mxu0 %v3254_v7  ;;  %1025 = vmatpush1.bf16.msra.mxu1 %v3256_v8  ;;  %v3553_v7 = vld [vmem:[%s5239_s5 + $0xc] ss:$16 sps:$4 sm:$0xff]   ;;  %v3548_v8 = vld [vmem:[%s5239_s5] ss:$16 sps:$4 sm:$0xff]  }
  0x63   :  { %1051 = vmatprep.subr.bf16.mxu0 %v3203_v9  ;;  %1092 = vmatprep.subr.bf16.mxu1 %v3205_v10  ;;  %v3551_v9 = vld [vmem:[%s5239_s5 + $0x8] ss:$16 sps:$4 sm:$0xff]   ;;  %v3556_v10 = vld [vmem:[%s5239_s5 + $0x24] ss:$16 sps:$4 sm:$0xff]  }
  0x65   :  { %1002 = vmatmul.mubr.bf16.vlgmr.msra.gmra.mrb[8].mxu0 %v4313_v16  ;;  %1043 = vmatmul.mubr.bf16.vlgmr.msra.gmra.mrb[8].mxu1 %v4313_v16 }
  0x66   :  { %1052 = vmatpush1.bf16.msra.mxu0 %v3202_v17  ;;  %1093 = vmatpush1.bf16.msra.mxu1 %v3204_v18  ;;  %v3560_v17 = vld [vmem:[%s5239_s5 + $0x40] ss:$16 sps:$4 sm:$0xff]   ;;  %v3563_v18 = vld [vmem:[%s5239_s5 + $0x48] ss:$16 sps:$4 sm:$0xff]  }
  0x67   :  { %1053 = vmatprep.subr.bf16.mxu0 %v3211_v19  ;;  %1094 = vmatprep.subr.bf16.mxu1 %v3213_v20  ;;  %v3568_v19 = vld [vmem:[%s5239_s5 + $0x64] ss:$16 sps:$4 sm:$0xff]   ;;  %v3571_v20 = vld [vmem:[%s5239_s5 + $0x6c] ss:$16 sps:$4 sm:$0xff]  }
  0x68   :  { %1083 = vmatprep.mubr.bf16.mxu0 %v3932_v3  ;;  %1124 = vmatprep.mubr.bf16.mxu1 %v3932_v3  ;;  %v71_v3 = vld [vmem:[%s5237_s2 + $0x118] sm:$0xff] }
  0x69   :  { %v3237_v42 = vcombine.high %v71_v3, %v75_v38  ;;  %v3236_v48 = vcombine.low %v71_v3, %v75_v38  ;;  %v3598_v3 = vld [vmem:[%s5239_s5 + $0x104] ss:$16 sps:$4 sm:$0xff]   ;;  %v3601_v38 = vld [vmem:[%s5239_s5 + $0x10c] ss:$16 sps:$4 sm:$0xff]  }
  0x6a   :  { %1054 = vmatpush1.bf16.msra.mxu0 %v3210_v25  ;;  %1095 = vmatpush1.bf16.msra.mxu1 %v3212_v26  ;;  %v3572_v25 = vld [vmem:[%s5239_s5 + $0x80] ss:$16 sps:$4 sm:$0xff]   ;;  %v3575_v26 = vld [vmem:[%s5239_s5 + $0x88] ss:$16 sps:$4 sm:$0xff]  }
  0x6b   :  { %1055 = vmatprep.subr.bf16.mxu0 %v3219_v27  ;;  %1096 = vmatprep.subr.bf16.mxu1 %v3221_v28  ;;  %v3580_v27 = vld [vmem:[%s5239_s5 + $0xa4] ss:$16 sps:$4 sm:$0xff]   ;;  %v3583_v28 = vld [vmem:[%s5239_s5 + $0xac] ss:$16 sps:$4 sm:$0xff]  }
  0x6e   :  { %1056 = vmatpush1.bf16.msra.mxu0 %v3218_v32  ;;  %1097 = vmatpush1.bf16.msra.mxu1 %v3220_v33  ;;  %v3584_v32 = vld [vmem:[%s5239_s5 + $0xc0] ss:$16 sps:$4 sm:$0xff]   ;;  %v3587_v33 = vld [vmem:[%s5239_s5 + $0xc8] ss:$16 sps:$4 sm:$0xff]  }
  0x6f   :  { %1057 = vmatprep.subr.bf16.mxu0 %v3227_v34  ;;  %1098 = vmatprep.subr.bf16.mxu1 %v3229_v35  ;;  %v3592_v34 = vld [vmem:[%s5239_s5 + $0xe4] ss:$16 sps:$4 sm:$0xff]   ;;  %v3595_v35 = vld [vmem:[%s5239_s5 + $0xec] ss:$16 sps:$4 sm:$0xff]  }
  0x72   :  { %1058 = vmatpush1.bf16.msra.mxu0 %v3226_v39  ;;  %1099 = vmatpush1.bf16.msra.mxu1 %v3228_v40  ;;  %v3596_v39 = vld [vmem:[%s5239_s5 + $0x100] ss:$16 sps:$4 sm:$0xff]   ;;  %v3599_v40 = vld [vmem:[%s5239_s5 + $0x108] ss:$16 sps:$4 sm:$0xff]  }
  0x73   :  { %1059 = vmatprep.subr.bf16.mxu0 %v3235_v41  ;;  %1100 = vmatprep.subr.bf16.mxu1 %v3237_v42  ;;  %v3604_v41 = vld [vmem:[%s5239_s5 + $0x124] ss:$16 sps:$4 sm:$0xff]   ;;  %v3602_v42 = vld [vmem:[%s5239_s5 + $0x120] ss:$16 sps:$4 sm:$0xff]  }
  0x76   :  { %1060 = vmatpush1.bf16.msra.mxu0 %v3234_v47  ;;  %1101 = vmatpush1.bf16.msra.mxu1 %v3236_v48  ;;  %v3608_v47 = vld [vmem:[%s5239_s5 + $0x140] ss:$16 sps:$4 sm:$0xff]   ;;  %v3611_v48 = vld [vmem:[%s5239_s5 + $0x148] ss:$16 sps:$4 sm:$0xff]  }
  0x77   :  { %1061 = vmatprep.subr.bf16.mxu0 %v3243_v49  ;;  %1102 = vmatprep.subr.bf16.mxu1 %v3245_v50  ;;  %v3616_v49 = vld [vmem:[%s5239_s5 + $0x164] ss:$16 sps:$4 sm:$0xff]   ;;  %v3619_v50 = vld [vmem:[%s5239_s5 + $0x16c] ss:$16 sps:$4 sm:$0xff]  }
  0x7a   :  { %1062 = vmatpush1.bf16.msra.mxu0 %v3242_v55  ;;  %1103 = vmatpush1.bf16.msra.mxu1 %v3244_v56  ;;  %v3620_v55 = vld [vmem:[%s5239_s5 + $0x180] ss:$16 sps:$4 sm:$0xff]   ;;  %v3623_v56 = vld [vmem:[%s5239_s5 + $0x188] ss:$16 sps:$4 sm:$0xff]  }
  0x7b   :  { %1063 = vmatprep.subr.bf16.mxu0 %v3251_v57  ;;  %1104 = vmatprep.subr.bf16.mxu1 %v3253_v58  ;;  %v3628_v57 = vld [vmem:[%s5239_s5 + $0x1a4] ss:$16 sps:$4 sm:$0xff]   ;;  %v3631_v58 = vld [vmem:[%s5239_s5 + $0x1ac] ss:$16 sps:$4 sm:$0xff]  }
  0x7e   :  { %1064 = vmatpush1.bf16.msra.mxu0 %v3250_v63  ;;  %1105 = vmatpush1.bf16.msra.mxu1 %v3252_v0  ;;  %v3635_v63 = vld [vmem:[%s5239_s5 + $0x1c8] ss:$16 sps:$4 sm:$0xff]   ;;  %v3637_v0 = vld [vmem:[%s5239_s5 + $0x1cc] ss:$16 sps:$4 sm:$0xff]  }
  0x7f   :  { %1065 = vmatprep.subr.bf16.mxu0 %v3259_v1  ;;  %1106 = vmatprep.subr.bf16.mxu1 %v3261_v2  ;;  %v3640_v1 = vld [vmem:[%s5239_s5 + $0x1e4] ss:$16 sps:$4 sm:$0xff]   ;;  %v3643_v2 = vld [vmem:[%s5239_s5 + $0x1ec] ss:$16 sps:$4 sm:$0xff]  }
  0x82   :  { %1066 = vmatpush1.bf16.msra.mxu0 %v3258_v4  ;;  %1107 = vmatpush1.bf16.msra.mxu1 %v3260_v5  ;;  %v3638_v4 = vld [vmem:[%s5239_s5 + $0x1e0] ss:$16 sps:$4 sm:$0xff]   ;;  %v3641_v5 = vld [vmem:[%s5239_s5 + $0x1e8] ss:$16 sps:$4 sm:$0xff]  }
  0x83   :  { %2757 = vmatprep.subr.bf16.mxu0 %v3550_v6  ;;  %2921 = vmatprep.subr.bf16.mxu1 %v3553_v7  ;;  %v3646_v6 = vld [vmem:[%s5239_s5 + $0x204] ss:$16 sps:$4 sm:$0xff]   ;;  %v3649_v7 = vld [vmem:[%s5239_s5 + $0x20c] ss:$16 sps:$4 sm:$0xff]  }
  0x85   :  { %1084 = vmatmul.mubr.bf16.vlgmr.msra.gmra.mrb[12].mxu0 %v4313_v16  ;;  %1125 = vmatmul.mubr.bf16.vlgmr.msra.gmra.mrb[12].mxu1 %v4313_v16  ;;  %v3565_v16 = vld [vmem:[%s5239_s5 + $0x4c] ss:$16 sps:$4 sm:$0xff]  }
  0x86   :  { %2758 = vmatpush1.bf16.msra.mxu0 %v3548_v8  ;;  %2922 = vmatpush1.bf16.msra.mxu1 %v3551_v9  ;;  %v1135_v8 = vlaneseq }
  0x87   :  { %2759 = vmatprep.subr.bf16.mxu0 %v3556_v10  ;;  %2923 = vmatprep.subr.bf16.mxu1 %v3559_v11  ;;  %v1133_v11 = vld [vmem:[%s5240_s4] sm:$0xff] }
  0x88   :  { %v1136_v9 = vshrl.u32 %v1135_v8, 7  ;;  %v3661_v8 = vld [vmem:[%s5239_s5 + $0x24c] ss:$16 sps:$4 sm:$0xff]  }
  0x8a   :  { %2760 = vmatpush1.bf16.msra.mxu0 %v3554_v13  ;;  %2924 = vmatpush1.bf16.msra.mxu1 %v3557_v14  ;;  %v1153_v10 = vsub.s32 4, %v1136_v9  ;;  %v1161_v13 = vsub.s32 6, %v1136_v9  ;;  %v1157_v14 = vsub.s32 5, %v1136_v9 }
  0x8b   :  { %2761 = vmatprep.subr.bf16.mxu0 %v3562_v15  ;;  %2925 = vmatprep.subr.bf16.mxu1 %v3565_v16  ;;  %v1165_v15 = vsub.s32 7, %v1136_v9 }
  0x8c   :  { %v4594_v16 = vrot.slane %v1133_v11, %v1153_v10  ;;  %v3659_v10 = vld [vmem:[%s5239_s5 + $0x248] ss:$16 sps:$4 sm:$0xff]  }
  0x8e   :  { %2762 = vmatpush1.bf16.msra.mxu0 %v3560_v17  ;;  %2926 = vmatpush1.bf16.msra.mxu1 %v3563_v18  ;;  %v4596_v17 = vrot.slane %v1133_v11, %v1161_v13  ;;  %v4598_v18 = vrot.slane %v1133_v11, %v1157_v14  ;;  %v3667_v13 = vld [vmem:[%s5239_s5 + $0x26c] ss:$16 sps:$4 sm:$0xff]   ;;  %v3662_v14 = vld [vmem:[%s5239_s5 + $0x260] ss:$16 sps:$4 sm:$0xff]  }
  0x8f   :  { %2763 = vmatprep.subr.bf16.mxu0 %v3568_v19  ;;  %2927 = vmatprep.subr.bf16.mxu1 %v3571_v20  ;;  %v4600_v19 = vrot.slane %v1133_v11, %v1165_v15  ;;  %v3665_v15 = vld [vmem:[%s5239_s5 + $0x268] ss:$16 sps:$4 sm:$0xff]  }
  0x92   :  { %2764 = vmatpush1.bf16.msra.mxu0 %v3566_v21  ;;  %2928 = vmatpush1.bf16.msra.mxu1 %v3569_v22 }
  0x93   :  { %2765 = vmatprep.subr.bf16.mxu0 %v3574_v23  ;;  %2929 = vmatprep.subr.bf16.mxu1 %v3577_v24 }
  0x96   :  { %2766 = vmatpush1.bf16.msra.mxu0 %v3572_v25  ;;  %2930 = vmatpush1.bf16.msra.mxu1 %v3575_v26 }
  0x97   :  { %2767 = vmatprep.subr.bf16.mxu0 %v3580_v27  ;;  %2931 = vmatprep.subr.bf16.mxu1 %v3583_v28 }
  0x9a   :  { %2768 = vmatpush1.bf16.msra.mxu0 %v3578_v12  ;;  %2932 = vmatpush1.bf16.msra.mxu1 %v3581_v29 }
  0x9b   :  { %2769 = vmatprep.subr.bf16.mxu0 %v3586_v30  ;;  %2933 = vmatprep.subr.bf16.mxu1 %v3589_v31 }
  0x9e   :  { %2770 = vmatpush1.bf16.msra.mxu0 %v3584_v32  ;;  %2934 = vmatpush1.bf16.msra.mxu1 %v3587_v33 }
  0x9f   :  { %2771 = vmatprep.subr.bf16.mxu0 %v3592_v34  ;;  %2935 = vmatprep.subr.bf16.mxu1 %v3595_v35  ;;  %v4610_v35 = vsub.s32 0, %v1136_v9 }
  0xa2   :  { %2772 = vmatpush1.bf16.msra.mxu0 %v3590_v36  ;;  %2936 = vmatpush1.bf16.msra.mxu1 %v3593_v37  ;;  %v4612_v36 = vsub.s32 2, %v1136_v9  ;;  %v4614_v37 = vsub.s32 1, %v1136_v9 }
  0xa3   :  { %2773 = vmatprep.subr.bf16.mxu0 %v3598_v3  ;;  %2937 = vmatprep.subr.bf16.mxu1 %v3601_v38  ;;  %v4616_v3 = vsub.s32 3, %v1136_v9  ;;  %v1138_v38 = vrot.slane %v1133_v11, %v4610_v35  ;;  %v3656_v9 = vld [vmem:[%s5239_s5 + $0x240] ss:$16 sps:$4 sm:$0xff]  }
  0xa6   :  { %2774 = vmatpush1.bf16.msra.mxu0 %v3596_v39  ;;  %2938 = vmatpush1.bf16.msra.mxu1 %v3599_v40  ;;  %v1146_v40 = vrot.slane %v1133_v11, %v4612_v36 }
  0xa7   :  { %2775 = vmatprep.subr.bf16.mxu0 %v3604_v41  ;;  %2939 = vmatprep.subr.bf16.mxu1 %v3607_v43  ;;  %v1142_v41 = vrot.slane %v1133_v11, %v4614_v37 }
  0xaa   :  { %2776 = vmatpush1.bf16.msra.mxu0 %v3602_v42  ;;  %2940 = vmatpush1.bf16.msra.mxu1 %v3605_v44 }
  0xab   :  { %2777 = vmatprep.subr.bf16.mxu0 %v3610_v45  ;;  %2941 = vmatprep.subr.bf16.mxu1 %v3613_v46  ;;  %v1150_v45 = vrot.slane %v1133_v11, %v4616_v3  ;;  %v3664_v11 = vld [vmem:[%s5239_s5 + $0x264] ss:$16 sps:$4 sm:$0xff]  }
  0xae   :  { %2778 = vmatpush1.bf16.msra.mxu0 %v3608_v47  ;;  %2942 = vmatpush1.bf16.msra.mxu1 %v3611_v48 }
  0xaf   :  { %2779 = vmatprep.subr.bf16.mxu0 %v3616_v49  ;;  %2943 = vmatprep.subr.bf16.mxu1 %v3619_v50 }
  0xb2   :  { %2780 = vmatpush1.bf16.msra.mxu0 %v3614_v51  ;;  %2944 = vmatpush1.bf16.msra.mxu1 %v3617_v52 }
  0xb3   :  { %2781 = vmatprep.subr.bf16.mxu0 %v3622_v53  ;;  %2945 = vmatprep.subr.bf16.mxu1 %v3625_v54 }
  0xb6   :  { %2782 = vmatpush1.bf16.msra.mxu0 %v3620_v55  ;;  %2946 = vmatpush1.bf16.msra.mxu1 %v3623_v56 }
  0xb7   :  { %2783 = vmatprep.subr.bf16.mxu0 %v3628_v57  ;;  %2947 = vmatprep.subr.bf16.mxu1 %v3631_v58 }
  0xba   :  { %2784 = vmatpush1.bf16.msra.mxu0 %v3626_v59  ;;  %2948 = vmatpush1.bf16.msra.mxu1 %v3629_v60 }
  0xbb   :  { %2785 = vmatprep.subr.bf16.mxu0 %v3634_v61  ;;  %2949 = vmatprep.subr.bf16.mxu1 %v3637_v0 }
  0xbe   :  { %2786 = vmatpush1.bf16.msra.mxu0 %v3632_v62  ;;  %2950 = vmatpush1.bf16.msra.mxu1 %v3635_v63  ;;  %v3644_v62 = vld [vmem:[%s5239_s5 + $0x200] ss:$16 sps:$4 sm:$0xff]   ;;  %v3647_v63 = vld [vmem:[%s5239_s5 + $0x208] ss:$16 sps:$4 sm:$0xff]  }
  0xbf   :  { %2787 = vmatprep.subr.bf16.mxu0 %v3640_v1  ;;  %2951 = vmatprep.subr.bf16.mxu1 %v3643_v2  ;;  %v3652_v1 = vld [vmem:[%s5239_s5 + $0x224] ss:$16 sps:$4 sm:$0xff]   ;;  %v3655_v2 = vld [vmem:[%s5239_s5 + $0x22c] ss:$16 sps:$4 sm:$0xff]  }
  0xc2   :  { %2788 = vmatpush1.bf16.msra.mxu0 %v3638_v4  ;;  %2952 = vmatpush1.bf16.msra.mxu1 %v3641_v5  ;;  %v3650_v5 = vld [vmem:[%s5239_s5 + $0x220] ss:$16 sps:$4 sm:$0xff]  }
  0xc3   :  { %2798 = vmatprep.subr.bf16.mxu0 %v3646_v6  ;;  %2962 = vmatprep.subr.bf16.mxu1 %v3649_v7  ;;  %v3653_v6 = vld [vmem:[%s5239_s5 + $0x228] ss:$16 sps:$4 sm:$0xff]   ;;  %v3658_v7 = vld [vmem:[%s5239_s5 + $0x244] ss:$16 sps:$4 sm:$0xff]  }
  0xf8   :  { %v519_v20 = vpop.f32.mrb[0].mxu0  ;;  %v560_v22 = vpop.f32.mrb[0].mxu1 }
  0xf9   :  { %v521_v21 = vpop.f32.mrb[1].mxu0  ;;  %v562_v24 = vpop.f32.mrb[1].mxu1 }
  0xfa   :  { %v523_v23 = vpop.f32.mrb[2].mxu0  ;;  %v564_v26 = vpop.f32.mrb[2].mxu1 }
  0xfb   :  { %v524_v25 = vpop.f32.mrb[3].mxu0  ;;  %v565_v27 = vpop.f32.mrb[3].mxu1  ;;  %v3671_v23 = vld [vmem:[%s5239_s5 + $0x288] ss:$16 sps:$4 sm:$0xff]   ;;  %v3674_v26 = vld [vmem:[%s5239_s5 + $0x2a0] ss:$16 sps:$4 sm:$0xff]  }
  0xfc   :  { %v3679_v25 = vld [vmem:[%s5239_s5 + $0x2ac] ss:$16 sps:$4 sm:$0xff]   ;;  %v3677_v27 = vld [vmem:[%s5239_s5 + $0x2a8] ss:$16 sps:$4 sm:$0xff]  }
 0x118   :  { %v4602_v28 = vpop.f32.mrb[4].mxu0  ;;  %v4606_v29 = vpop.f32.mrb[4].mxu1 }
 0x119   :  { %v4604_v12 = vpop.f32.mrb[5].mxu0  ;;  %v4608_v31 = vpop.f32.mrb[5].mxu1 }
 0x11a   :  { %v605_v30 = vpop.f32.mrb[6].mxu0  ;;  %v646_v33 = vpop.f32.mrb[6].mxu1 }
 0x11b   :  { %v606_v32 = vpop.f32.mrb[7].mxu0  ;;  %v647_v34 = vpop.f32.mrb[7].mxu1  ;;  %v3682_v30 = vld [vmem:[%s5239_s5 + $0x2c4] ss:$16 sps:$4 sm:$0xff]  }
 0x11c   :  { %v3685_v32 = vld [vmem:[%s5239_s5 + $0x2cc] ss:$16 sps:$4 sm:$0xff]   ;;  %v3680_v34 = vld [vmem:[%s5239_s5 + $0x2c0] ss:$16 sps:$4 sm:$0xff]  }
 0x138   :  { %v1003_v39 = vpop.f32.mrb[8].mxu0  ;;  %v1044_v43 = vpop.f32.mrb[8].mxu1 }
 0x139   :  { %v1004_v42 = vadd.f32 %v1003_v39, %v519_v20  ;;  %v1005_v44 = vpop.f32.mrb[9].mxu0  ;;  %v1045_v46 = vadd.f32 %v1044_v43, %v560_v22  ;;  %v1046_v48 = vpop.f32.mrb[9].mxu1  ;;  %v3670_v20 = vld [vmem:[%s5239_s5 + $0x284] ss:$16 sps:$4 sm:$0xff]   ;;  %v3668_v22 = vld [vmem:[%s5239_s5 + $0x280] ss:$16 sps:$4 sm:$0xff]  }
 0x13a   :  { %v1006_v47 = vadd.f32 %v1005_v44, %v521_v21  ;;  %v1007_v49 = vpop.f32.mrb[10].mxu0  ;;  %v1047_v51 = vadd.f32 %v1046_v48, %v562_v24  ;;  %v1048_v53 = vpop.f32.mrb[10].mxu1  ;;  %v3673_v21 = vld [vmem:[%s5239_s5 + $0x28c] ss:$16 sps:$4 sm:$0xff]   ;;  %v3676_v24 = vld [vmem:[%s5239_s5 + $0x2a4] ss:$16 sps:$4 sm:$0xff]  }
 0x13b   :  { %v1175_v50 = vadd.f32 %v1138_v38, %v1004_v42  ;;  %v1008_v52 = vpop.f32.mrb[11].mxu0  ;;  %v4622_v54 = vadd.f32 %v1146_v40, %v1045_v46  ;;  %v1049_v56 = vpop.f32.mrb[11].mxu1  ;;  %v3683_v38 = vld [vmem:[%s5239_s5 + $0x2c8] ss:$16 sps:$4 sm:$0xff]   ;;  %v3688_v42 = vld [vmem:[%s5239_s5 + $0x2e4] ss:$16 sps:$4 sm:$0xff]  }
 0x13c   :  { %v1176_v55 = vadd.f32 %v1142_v41, %v1006_v47  ;;  %v1178_v58 = vadd.f32 %v1150_v45, %v1047_v51  ;;  %v3691_v43 = vld [vmem:[%s5239_s5 + $0x2ec] ss:$16 sps:$4 sm:$0xff]   ;;  %v3692_v53 = vld [vmem:[%s5239_s5 + $0x300] ss:$16 sps:$4 sm:$0xff]  }
 0x13d   :  { %v1183_v57 = vmax.f32 %v1175_v50, 0.0  ;;  %v3703_v56 = vld [vmem:[%s5239_s5 + $0x32c] ss:$16 sps:$4 sm:$0xff]  }
 0x13e   :  { %v1184_v59 = vmax.f32 %v1176_v55, 0.0  ;;  %v1186_v60 = vmax.f32 %v1178_v58, 0.0  ;;  %v3700_v55 = vld [vmem:[%s5239_s5 + $0x324] ss:$16 sps:$4 sm:$0xff]   ;;  %v3701_v58 = vld [vmem:[%s5239_s5 + $0x328] ss:$16 sps:$4 sm:$0xff]  }
 0x13f   :  { %v1191_v0 = vpack.c.bf16 %v1183_v57, %v1183_v57  ;;  %v3698_v57 = vld [vmem:[%s5239_s5 + $0x320] ss:$16 sps:$4 sm:$0xff]  }
 0x140   :  { %v1192_v61 = vpack.c.bf16 %v1184_v59, %v1184_v59  ;;  %v1194_v4 = vpack.c.bf16 %v1186_v60, %v1186_v60  ;;  %v3706_v59 = vld [vmem:[%s5239_s5 + $0x344] ss:$16 sps:$4 sm:$0xff]   ;;  %v3709_v60 = vld [vmem:[%s5239_s5 + $0x34c] ss:$16 sps:$4 sm:$0xff]  }
 0x142   :  { %2789 = vmatprep.mubr.bf16.mxu0 %v1192_v61  ;;  %2953 = vmatprep.mubr.bf16.mxu1 %v1192_v61  ;;  %v3704_v61 = vld [vmem:[%s5239_s5 + $0x340] ss:$16 sps:$4 sm:$0xff]  }
 0x143   :  { %2790 = vmatmul.mubr.bf16.vlgmr.msra.gmra.mrb[16].mxu0 %v1191_v0  ;;  %2954 = vmatmul.mubr.bf16.vlgmr.msra.gmra.mrb[16].mxu1 %v1191_v0  ;;  %v3715_v0 = vld [vmem:[%s5239_s5 + $0x36c] ss:$16 sps:$4 sm:$0xff]  }
 0x144   :  { %2799 = vmatpush1.bf16.msra.mxu0 %v3644_v62  ;;  %2963 = vmatpush1.bf16.msra.mxu1 %v3647_v63  ;;  %v3707_v62 = vld [vmem:[%s5239_s5 + $0x348] ss:$16 sps:$4 sm:$0xff]   ;;  %v3712_v63 = vld [vmem:[%s5239_s5 + $0x364] ss:$16 sps:$4 sm:$0xff]  }
 0x145   :  { %2830 = vmatprep.mubr.bf16.mxu0 %v1194_v4  ;;  %2994 = vmatprep.mubr.bf16.mxu1 %v1194_v4  ;;  %v3718_v4 = vld [vmem:[%s5239_s5 + $0x384] ss:$16 sps:$4 sm:$0xff]  }
 0x146   :  { %2800 = vmatprep.subr.bf16.mxu0 %v3652_v1  ;;  %2964 = vmatprep.subr.bf16.mxu1 %v3655_v2  ;;  %v3710_v1 = vld [vmem:[%s5239_s5 + $0x360] ss:$16 sps:$4 sm:$0xff]   ;;  %v3713_v2 = vld [vmem:[%s5239_s5 + $0x368] ss:$16 sps:$4 sm:$0xff]  }
 0x148   :  { %2801 = vmatpush1.bf16.msra.mxu0 %v3650_v5  ;;  %2965 = vmatpush1.bf16.msra.mxu1 %v3653_v6  ;;  %v3721_v5 = vld [vmem:[%s5239_s5 + $0x38c] ss:$16 sps:$4 sm:$0xff]   ;;  %v3716_v6 = vld [vmem:[%s5239_s5 + $0x380] ss:$16 sps:$4 sm:$0xff]  }
 0x149   :  { %2802 = vmatprep.subr.bf16.mxu0 %v3658_v7  ;;  %2966 = vmatprep.subr.bf16.mxu1 %v3661_v8  ;;  %v3719_v7 = vld [vmem:[%s5239_s5 + $0x388] ss:$16 sps:$4 sm:$0xff]   ;;  %v3724_v8 = vld [vmem:[%s5239_s5 + $0x3a4] ss:$16 sps:$4 sm:$0xff]  }
 0x14c   :  { %2803 = vmatpush1.bf16.msra.mxu0 %v3656_v9  ;;  %2967 = vmatpush1.bf16.msra.mxu1 %v3659_v10  ;;  %v3727_v9 = vld [vmem:[%s5239_s5 + $0x3ac] ss:$16 sps:$4 sm:$0xff]   ;;  %v3722_v10 = vld [vmem:[%s5239_s5 + $0x3a0] ss:$16 sps:$4 sm:$0xff]  }
 0x14d   :  { %2804 = vmatprep.subr.bf16.mxu0 %v3664_v11  ;;  %2968 = vmatprep.subr.bf16.mxu1 %v3667_v13  ;;  %v3725_v11 = vld [vmem:[%s5239_s5 + $0x3a8] ss:$16 sps:$4 sm:$0xff]   ;;  %v3730_v13 = vld [vmem:[%s5239_s5 + $0x3c4] ss:$16 sps:$4 sm:$0xff]  }
 0x150   :  { %2805 = vmatpush1.bf16.msra.mxu0 %v3662_v14  ;;  %2969 = vmatpush1.bf16.msra.mxu1 %v3665_v15  ;;  %v3733_v14 = vld [vmem:[%s5239_s5 + $0x3cc] ss:$16 sps:$4 sm:$0xff]   ;;  %v3728_v15 = vld [vmem:[%s5239_s5 + $0x3c0] ss:$16 sps:$4 sm:$0xff]  }
 0x151   :  { %2806 = vmatprep.subr.bf16.mxu0 %v3670_v20  ;;  %2970 = vmatprep.subr.bf16.mxu1 %v3673_v21  ;;  %v3731_v20 = vld [vmem:[%s5239_s5 + $0x3c8] ss:$16 sps:$4 sm:$0xff]   ;;  %v3736_v21 = vld [vmem:[%s5239_s5 + $0x3e4] ss:$16 sps:$4 sm:$0xff]  }
 0x154   :  { %2807 = vmatpush1.bf16.msra.mxu0 %v3668_v22  ;;  %2971 = vmatpush1.bf16.msra.mxu1 %v3671_v23  ;;  %v3739_v22 = vld [vmem:[%s5239_s5 + $0x3ec] ss:$16 sps:$4 sm:$0xff]   ;;  %v3734_v23 = vld [vmem:[%s5239_s5 + $0x3e0] ss:$16 sps:$4 sm:$0xff]  }
 0x155   :  { %2808 = vmatprep.subr.bf16.mxu0 %v3676_v24  ;;  %2972 = vmatprep.subr.bf16.mxu1 %v3679_v25  ;;  %v3737_v24 = vld [vmem:[%s5239_s5 + $0x3e8] ss:$16 sps:$4 sm:$0xff]   ;;  %v1185_v25 = vmax.f32 %v4622_v54, 0.0 }
 0x156   :  { %v3743_v54 = vld [vmem:[%s5239_s5 + $0x408] ss:$16 sps:$4 sm:$0xff]  }
 0x158   :  { %2809 = vmatpush1.bf16.msra.mxu0 %v3674_v26  ;;  %2973 = vmatpush1.bf16.msra.mxu1 %v3677_v27  ;;  %v1085_v33 = vpop.f32.mrb[12].mxu0  ;;  %v1126_v40 = vpop.f32.mrb[12].mxu1  ;;  %v3742_v26 = vld [vmem:[%s5239_s5 + $0x404] ss:$16 sps:$4 sm:$0xff]   ;;  %v3745_v27 = vld [vmem:[%s5239_s5 + $0x40c] ss:$16 sps:$4 sm:$0xff]  }
 0x159   :  { %v1086_v39 = vadd.f32 %v1085_v33, %v4602_v28  ;;  %v1087_v41 = vpop.f32.mrb[13].mxu0  ;;  %2810 = vmatprep.subr.bf16.mxu0 %v3682_v30  ;;  %2974 = vmatprep.subr.bf16.mxu1 %v3685_v32  ;;  %v1127_v44 = vadd.f32 %v1126_v40, %v4606_v29  ;;  %v1128_v46 = vpop.f32.mrb[13].mxu1  ;;  %v3740_v32 = vld [vmem:[%s5239_s5 + $0x400] ss:$16 sps:$4 sm:$0xff]   ;;  %v1193_v33 = vpack.c.bf16 %v1185_v25, %v1185_v25  ;;  %v3823_v25 = vld [vmem:[%s5239_s5 + $0x5ac] ss:$16 sps:$4 sm:$0xff]  }
 0x15a   :  { %v1088_v45 = vadd.f32 %v1087_v41, %v4604_v12  ;;  %v1089_v47 = vpop.f32.mrb[14].mxu0  ;;  %v1129_v48 = vadd.f32 %v1128_v46, %v4608_v31  ;;  %v1130_v50 = vpop.f32.mrb[14].mxu1  ;;  %v3686_v12 = vld [vmem:[%s5239_s5 + $0x2e0] ss:$16 sps:$4 sm:$0xff]   ;;  %v3749_v41 = vld [vmem:[%s5239_s5 + $0x428] ss:$16 sps:$4 sm:$0xff]  }
 0x15b   :  { %v4712_v28 = vadd.f32 %v4594_v16, %v1086_v39  ;;  %v1090_v49 = vpop.f32.mrb[15].mxu0  ;;  %v4716_v51 = vadd.f32 %v4596_v17, %v1127_v44  ;;  %v3689_v16 = vld [vmem:[%s5239_s5 + $0x2e8] ss:$16 sps:$4 sm:$0xff]   ;;  %v1131_v29 = vpop.f32.mrb[15].mxu1  ;;  %v3694_v17 = vld [vmem:[%s5239_s5 + $0x304] ss:$16 sps:$4 sm:$0xff]  }
 0x15c   :  { %v4719_v52 = vadd.f32 %v4598_v18, %v1088_v45  ;;  %2811 = vmatpush1.bf16.msra.mxu0 %v3680_v34  ;;  %2975 = vmatpush1.bf16.msra.mxu1 %v3683_v38  ;;  %v4728_v31 = vadd.f32 %v4600_v19, %v1129_v48  ;;  %v3697_v18 = vld [vmem:[%s5239_s5 + $0x30c] ss:$16 sps:$4 sm:$0xff]   ;;  %v3695_v19 = vld [vmem:[%s5239_s5 + $0x308] ss:$16 sps:$4 sm:$0xff]   ;;  %v3748_v38 = vld [vmem:[%s5239_s5 + $0x424] ss:$16 sps:$4 sm:$0xff]  }
 0x15d   :  { %2812 = vmatprep.subr.bf16.mxu0 %v3688_v42  ;;  %2976 = vmatprep.subr.bf16.mxu1 %v3691_v43  ;;  %v3751_v39 = vld [vmem:[%s5239_s5 + $0x42c] ss:$16 sps:$4 sm:$0xff]   ;;  %v3746_v40 = vld [vmem:[%s5239_s5 + $0x420] ss:$16 sps:$4 sm:$0xff]   ;;  %v3754_v42 = vld [vmem:[%s5239_s5 + $0x444] ss:$16 sps:$4 sm:$0xff]  }
 0x15e   :  { %v1188_v30 = vmax.f32 %v4719_v52, 0.0  ;;  %v3757_v43 = vld [vmem:[%s5239_s5 + $0x44c] ss:$16 sps:$4 sm:$0xff]   ;;  %v3752_v44 = vld [vmem:[%s5239_s5 + $0x440] ss:$16 sps:$4 sm:$0xff]  }
 0x15f   :  { %v3755_v45 = vld [vmem:[%s5239_s5 + $0x448] ss:$16 sps:$4 sm:$0xff]   ;;  %v3760_v46 = vld [vmem:[%s5239_s5 + $0x464] ss:$16 sps:$4 sm:$0xff]   ;;  %v3763_v47 = vld [vmem:[%s5239_s5 + $0x46c] ss:$16 sps:$4 sm:$0xff]  }
 0x160   :  { %2813 = vmatpush1.bf16.msra.mxu0 %v3686_v12  ;;  %2977 = vmatpush1.bf16.msra.mxu1 %v3689_v16  ;;  %v1196_v34 = vpack.c.bf16 %v1188_v30, %v1188_v30  ;;  %v3758_v48 = vld [vmem:[%s5239_s5 + $0x460] ss:$16 sps:$4 sm:$0xff]   ;;  %v3761_v49 = vld [vmem:[%s5239_s5 + $0x468] ss:$16 sps:$4 sm:$0xff]   ;;  %v3766_v50 = vld [vmem:[%s5239_s5 + $0x484] ss:$16 sps:$4 sm:$0xff]  }
 0x161   :  { %2814 = vmatprep.subr.bf16.mxu0 %v3694_v17  ;;  %2978 = vmatprep.subr.bf16.mxu1 %v3697_v18  ;;  %v3769_v52 = vld [vmem:[%s5239_s5 + $0x48c] ss:$16 sps:$4 sm:$0xff]   ;;  %v3764_v12 = vld [vmem:[%s5239_s5 + $0x480] ss:$16 sps:$4 sm:$0xff]   ;;  %v3767_v16 = vld [vmem:[%s5239_s5 + $0x488] ss:$16 sps:$4 sm:$0xff]  }
 0x162   :  { %v3772_v29 = vld [vmem:[%s5239_s5 + $0x4a4] ss:$16 sps:$4 sm:$0xff]   ;;  %v3775_v17 = vld [vmem:[%s5239_s5 + $0x4ac] ss:$16 sps:$4 sm:$0xff]   ;;  %v3770_v18 = vld [vmem:[%s5239_s5 + $0x4a0] ss:$16 sps:$4 sm:$0xff]  }
 0x163   :  { %v3826_v30 = vld [vmem:[%s5239_s5 + $0x5c4] ss:$16 sps:$4 sm:$0xff]  }
 0x164   :  { %2815 = vmatpush1.bf16.msra.mxu0 %v3692_v53  ;;  %2979 = vmatpush1.bf16.msra.mxu1 %v3695_v19  ;;  %v3773_v53 = vld [vmem:[%s5239_s5 + $0x4a8] ss:$16 sps:$4 sm:$0xff]   ;;  %v3778_v19 = vld [vmem:[%s5239_s5 + $0x4c4] ss:$16 sps:$4 sm:$0xff]  }
 0x165   :  { %2816 = vmatprep.subr.bf16.mxu0 %v3700_v55  ;;  %2980 = vmatprep.subr.bf16.mxu1 %v3703_v56  ;;  %v3781_v55 = vld [vmem:[%s5239_s5 + $0x4cc] ss:$16 sps:$4 sm:$0xff]   ;;  %v3776_v56 = vld [vmem:[%s5239_s5 + $0x4c0] ss:$16 sps:$4 sm:$0xff]  }
 0x168   :  { %2817 = vmatpush1.bf16.msra.mxu0 %v3698_v57  ;;  %2981 = vmatpush1.bf16.msra.mxu1 %v3701_v58  ;;  %v3779_v57 = vld [vmem:[%s5239_s5 + $0x4c8] ss:$16 sps:$4 sm:$0xff]   ;;  %v3784_v58 = vld [vmem:[%s5239_s5 + $0x4e4] ss:$16 sps:$4 sm:$0xff]  }
 0x169   :  { %2818 = vmatprep.subr.bf16.mxu0 %v3706_v59  ;;  %2982 = vmatprep.subr.bf16.mxu1 %v3709_v60  ;;  %v3787_v59 = vld [vmem:[%s5239_s5 + $0x4ec] ss:$16 sps:$4 sm:$0xff]   ;;  %v3782_v60 = vld [vmem:[%s5239_s5 + $0x4e0] ss:$16 sps:$4 sm:$0xff]  }
 0x16c   :  { %2819 = vmatpush1.bf16.msra.mxu0 %v3704_v61  ;;  %2983 = vmatpush1.bf16.msra.mxu1 %v3707_v62  ;;  %v3785_v61 = vld [vmem:[%s5239_s5 + $0x4e8] ss:$16 sps:$4 sm:$0xff]   ;;  %v3790_v62 = vld [vmem:[%s5239_s5 + $0x504] ss:$16 sps:$4 sm:$0xff]  }
 0x16d   :  { %2820 = vmatprep.subr.bf16.mxu0 %v3712_v63  ;;  %2984 = vmatprep.subr.bf16.mxu1 %v3715_v0  ;;  %v3793_v63 = vld [vmem:[%s5239_s5 + $0x50c] ss:$16 sps:$4 sm:$0xff]   ;;  %v3788_v0 = vld [vmem:[%s5239_s5 + $0x500] ss:$16 sps:$4 sm:$0xff]  }
 0x170   :  { %2821 = vmatpush1.bf16.msra.mxu0 %v3710_v1  ;;  %2985 = vmatpush1.bf16.msra.mxu1 %v3713_v2  ;;  %v3791_v1 = vld [vmem:[%s5239_s5 + $0x508] ss:$16 sps:$4 sm:$0xff]   ;;  %v3796_v2 = vld [vmem:[%s5239_s5 + $0x524] ss:$16 sps:$4 sm:$0xff]  }
 0x171   :  { %2822 = vmatprep.subr.bf16.mxu0 %v3718_v4  ;;  %2986 = vmatprep.subr.bf16.mxu1 %v3721_v5  ;;  %v3799_v4 = vld [vmem:[%s5239_s5 + $0x52c] ss:$16 sps:$4 sm:$0xff]   ;;  %v3794_v5 = vld [vmem:[%s5239_s5 + $0x520] ss:$16 sps:$4 sm:$0xff]  }
 0x174   :  { %2823 = vmatpush1.bf16.msra.mxu0 %v3716_v6  ;;  %2987 = vmatpush1.bf16.msra.mxu1 %v3719_v7  ;;  %v3797_v6 = vld [vmem:[%s5239_s5 + $0x528] ss:$16 sps:$4 sm:$0xff]   ;;  %v3802_v7 = vld [vmem:[%s5239_s5 + $0x544] ss:$16 sps:$4 sm:$0xff]  }
 0x175   :  { %2824 = vmatprep.subr.bf16.mxu0 %v3724_v8  ;;  %2988 = vmatprep.subr.bf16.mxu1 %v3727_v9  ;;  %v3805_v8 = vld [vmem:[%s5239_s5 + $0x54c] ss:$16 sps:$4 sm:$0xff]   ;;  %v3800_v9 = vld [vmem:[%s5239_s5 + $0x540] ss:$16 sps:$4 sm:$0xff]  }
 0x178   :  { %2825 = vmatpush1.bf16.msra.mxu0 %v3722_v10  ;;  %2989 = vmatpush1.bf16.msra.mxu1 %v3725_v11  ;;  %v3803_v10 = vld [vmem:[%s5239_s5 + $0x548] ss:$16 sps:$4 sm:$0xff]   ;;  %v3808_v11 = vld [vmem:[%s5239_s5 + $0x564] ss:$16 sps:$4 sm:$0xff]  }
 0x179   :  { %2826 = vmatprep.subr.bf16.mxu0 %v3730_v13  ;;  %2990 = vmatprep.subr.bf16.mxu1 %v3733_v14  ;;  %v3811_v13 = vld [vmem:[%s5239_s5 + $0x56c] ss:$16 sps:$4 sm:$0xff]   ;;  %v3806_v14 = vld [vmem:[%s5239_s5 + $0x560] ss:$16 sps:$4 sm:$0xff]  }
 0x17c   :  { %2827 = vmatpush1.bf16.msra.mxu0 %v3728_v15  ;;  %2991 = vmatpush1.bf16.msra.mxu1 %v3731_v20  ;;  %v3809_v15 = vld [vmem:[%s5239_s5 + $0x568] ss:$16 sps:$4 sm:$0xff]   ;;  %v3814_v20 = vld [vmem:[%s5239_s5 + $0x584] ss:$16 sps:$4 sm:$0xff]  }
 0x17d   :  { %2828 = vmatprep.subr.bf16.mxu0 %v3736_v21  ;;  %2992 = vmatprep.subr.bf16.mxu1 %v3739_v22  ;;  %v3817_v21 = vld [vmem:[%s5239_s5 + $0x58c] ss:$16 sps:$4 sm:$0xff]   ;;  %v3812_v22 = vld [vmem:[%s5239_s5 + $0x580] ss:$16 sps:$4 sm:$0xff]  }
 0x180   :  { %2829 = vmatpush1.bf16.msra.mxu0 %v3734_v23  ;;  %2993 = vmatpush1.bf16.msra.mxu1 %v3737_v24  ;;  %v3815_v23 = vld [vmem:[%s5239_s5 + $0x588] ss:$16 sps:$4 sm:$0xff]   ;;  %v3820_v24 = vld [vmem:[%s5239_s5 + $0x5a4] ss:$16 sps:$4 sm:$0xff]  }
 0x181   :  { %2839 = vmatprep.subr.bf16.mxu0 %v3742_v26  ;;  %3003 = vmatprep.subr.bf16.mxu1 %v3745_v27  ;;  %v3818_v26 = vld [vmem:[%s5239_s5 + $0x5a0] ss:$16 sps:$4 sm:$0xff]   ;;  %v3821_v27 = vld [vmem:[%s5239_s5 + $0x5a8] ss:$16 sps:$4 sm:$0xff]  }
 0x183   :  { %2831 = vmatmul.mubr.bf16.vlgmr.msra.gmra.mrb[16].mxu0 %v1193_v33  ;;  %2995 = vmatmul.mubr.bf16.vlgmr.msra.gmra.mrb[16].mxu1 %v1193_v33  ;;  %v3824_v33 = vld [vmem:[%s5239_s5 + $0x5c0] ss:$16 sps:$4 sm:$0xff]  }
 0x184   :  { %2840 = vmatpush1.bf16.msra.mxu0 %v3740_v32  ;;  %2871 = vmatprep.mubr.bf16.mxu0 %v1196_v34  ;;  %v3829_v32 = vld [vmem:[%s5239_s5 + $0x5cc] ss:$16 sps:$4 sm:$0xff]  }
 0x185   :  { %3004 = vmatpush1.bf16.msra.mxu1 %v3743_v54  ;;  %3035 = vmatprep.mubr.bf16.mxu1 %v1196_v34  ;;  %v3827_v54 = vld [vmem:[%s5239_s5 + $0x5c8] ss:$16 sps:$4 sm:$0xff]   ;;  %v3832_v34 = vld [vmem:[%s5239_s5 + $0x5e4] ss:$16 sps:$4 sm:$0xff]  }
 0x186   :  { %2841 = vmatprep.subr.bf16.mxu0 %v3748_v38  ;;  %3005 = vmatprep.subr.bf16.mxu1 %v3751_v39  ;;  %v3835_v38 = vld [vmem:[%s5239_s5 + $0x5ec] ss:$16 sps:$4 sm:$0xff]   ;;  %v3830_v39 = vld [vmem:[%s5239_s5 + $0x5e0] ss:$16 sps:$4 sm:$0xff]  }
 0x188   :  { %2842 = vmatpush1.bf16.msra.mxu0 %v3746_v40  ;;  %v1187_v40 = vmax.f32 %v4712_v28, 0.0  ;;  %v3836_v28 = vld [vmem:[%s5239_s5 + $0x600] ss:$16 sps:$4 sm:$0xff]  }
 0x189   :  { %3006 = vmatpush1.bf16.msra.mxu1 %v3749_v41  ;;  %2843 = vmatprep.subr.bf16.mxu0 %v3754_v42  ;;  %v3833_v41 = vld [vmem:[%s5239_s5 + $0x5e8] ss:$16 sps:$4 sm:$0xff]   ;;  %v3838_v42 = vld [vmem:[%s5239_s5 + $0x604] ss:$16 sps:$4 sm:$0xff]  }
 0x18a   :  { %3007 = vmatprep.subr.bf16.mxu1 %v3757_v43  ;;  %v3841_v43 = vld [vmem:[%s5239_s5 + $0x60c] ss:$16 sps:$4 sm:$0xff]  }
 0x18c   :  { %2844 = vmatpush1.bf16.msra.mxu0 %v3752_v44  ;;  %v1190_v44 = vmax.f32 %v4728_v31, 0.0  ;;  %v3847_v31 = vld [vmem:[%s5239_s5 + $0x62c] ss:$16 sps:$4 sm:$0xff]  }
 0x18d   :  { %3008 = vmatpush1.bf16.msra.mxu1 %v3755_v45  ;;  %2845 = vmatprep.subr.bf16.mxu0 %v3760_v46  ;;  %v1195_v45 = vpack.c.bf16 %v1187_v40, %v1187_v40  ;;  %v3839_v46 = vld [vmem:[%s5239_s5 + $0x608] ss:$16 sps:$4 sm:$0xff]   ;;  %v3914_v40 = vld [vmem:[%s5239_s5 + $0x7a0] ss:$16 sps:$4 sm:$0xff]  }
 0x18e   :  { %3009 = vmatprep.subr.bf16.mxu1 %v3763_v47  ;;  %v3844_v47 = vld [vmem:[%s5239_s5 + $0x624] ss:$16 sps:$4 sm:$0xff]  }
 0x190   :  { %2846 = vmatpush1.bf16.msra.mxu0 %v3758_v48  ;;  %v1198_v48 = vpack.c.bf16 %v1190_v44, %v1190_v44  ;;  %v3920_v44 = vld [vmem:[%s5239_s5 + $0x7c0] ss:$16 sps:$4 sm:$0xff]  }
 0x191   :  { %3010 = vmatpush1.bf16.msra.mxu1 %v3761_v49  ;;  %2847 = vmatprep.subr.bf16.mxu0 %v3766_v50  ;;  %v3842_v49 = vld [vmem:[%s5239_s5 + $0x620] ss:$16 sps:$4 sm:$0xff]   ;;  %v3845_v50 = vld [vmem:[%s5239_s5 + $0x628] ss:$16 sps:$4 sm:$0xff]  }
 0x192   :  { %3011 = vmatprep.subr.bf16.mxu1 %v3769_v52  ;;  %v3850_v52 = vld [vmem:[%s5239_s5 + $0x644] ss:$16 sps:$4 sm:$0xff]  }
 0x194   :  { %2848 = vmatpush1.bf16.msra.mxu0 %v3764_v12  ;;  %v3853_v12 = vld [vmem:[%s5239_s5 + $0x64c] ss:$16 sps:$4 sm:$0xff]  }
 0x195   :  { %3012 = vmatpush1.bf16.msra.mxu1 %v3767_v16  ;;  %2849 = vmatprep.subr.bf16.mxu0 %v3772_v29  ;;  %v3848_v16 = vld [vmem:[%s5239_s5 + $0x640] ss:$16 sps:$4 sm:$0xff]   ;;  %v3851_v29 = vld [vmem:[%s5239_s5 + $0x648] ss:$16 sps:$4 sm:$0xff]  }
 0x196   :  { %3013 = vmatprep.subr.bf16.mxu1 %v3775_v17  ;;  %v3856_v17 = vld [vmem:[%s5239_s5 + $0x664] ss:$16 sps:$4 sm:$0xff]  }
 0x198   :  { %2850 = vmatpush1.bf16.msra.mxu0 %v3770_v18  ;;  %v3859_v18 = vld [vmem:[%s5239_s5 + $0x66c] ss:$16 sps:$4 sm:$0xff]  }
 0x199   :  { %3014 = vmatpush1.bf16.msra.mxu1 %v3773_v53  ;;  %2851 = vmatprep.subr.bf16.mxu0 %v3778_v19  ;;  %v3854_v53 = vld [vmem:[%s5239_s5 + $0x660] ss:$16 sps:$4 sm:$0xff]   ;;  %v3857_v19 = vld [vmem:[%s5239_s5 + $0x668] ss:$16 sps:$4 sm:$0xff]  }
 0x19a   :  { %3015 = vmatprep.subr.bf16.mxu1 %v3781_v55  ;;  %v3862_v55 = vld [vmem:[%s5239_s5 + $0x684] ss:$16 sps:$4 sm:$0xff]  }
 0x19c   :  { %2852 = vmatpush1.bf16.msra.mxu0 %v3776_v56  ;;  %v3865_v56 = vld [vmem:[%s5239_s5 + $0x68c] ss:$16 sps:$4 sm:$0xff]  }
 0x19d   :  { %3016 = vmatpush1.bf16.msra.mxu1 %v3779_v57  ;;  %2853 = vmatprep.subr.bf16.mxu0 %v3784_v58  ;;  %v3860_v57 = vld [vmem:[%s5239_s5 + $0x680] ss:$16 sps:$4 sm:$0xff]   ;;  %v3863_v58 = vld [vmem:[%s5239_s5 + $0x688] ss:$16 sps:$4 sm:$0xff]  }
 0x19e   :  { %3017 = vmatprep.subr.bf16.mxu1 %v3787_v59  ;;  %v3868_v59 = vld [vmem:[%s5239_s5 + $0x6a4] ss:$16 sps:$4 sm:$0xff]  }
 0x1a0   :  { %2854 = vmatpush1.bf16.msra.mxu0 %v3782_v60  ;;  %v3871_v60 = vld [vmem:[%s5239_s5 + $0x6ac] ss:$16 sps:$4 sm:$0xff]  }
 0x1a1   :  { %3018 = vmatpush1.bf16.msra.mxu1 %v3785_v61  ;;  %2855 = vmatprep.subr.bf16.mxu0 %v3790_v62  ;;  %v3866_v61 = vld [vmem:[%s5239_s5 + $0x6a0] ss:$16 sps:$4 sm:$0xff]   ;;  %v3869_v62 = vld [vmem:[%s5239_s5 + $0x6a8] ss:$16 sps:$4 sm:$0xff]  }
 0x1a2   :  { %3019 = vmatprep.subr.bf16.mxu1 %v3793_v63  ;;  %v3874_v63 = vld [vmem:[%s5239_s5 + $0x6c4] ss:$16 sps:$4 sm:$0xff]  }
 0x1a4   :  { %2856 = vmatpush1.bf16.msra.mxu0 %v3788_v0  ;;  %v3877_v0 = vld [vmem:[%s5239_s5 + $0x6cc] ss:$16 sps:$4 sm:$0xff]  }
 0x1a5   :  { %3020 = vmatpush1.bf16.msra.mxu1 %v3791_v1  ;;  %2857 = vmatprep.subr.bf16.mxu0 %v3796_v2  ;;  %v3872_v1 = vld [vmem:[%s5239_s5 + $0x6c0] ss:$16 sps:$4 sm:$0xff]   ;;  %v3875_v2 = vld [vmem:[%s5239_s5 + $0x6c8] ss:$16 sps:$4 sm:$0xff]  }
 0x1a6   :  { %3021 = vmatprep.subr.bf16.mxu1 %v3799_v4  ;;  %v3880_v4 = vld [vmem:[%s5239_s5 + $0x6e4] ss:$16 sps:$4 sm:$0xff]  }
 0x1a8   :  { %2858 = vmatpush1.bf16.msra.mxu0 %v3794_v5  ;;  %v3883_v5 = vld [vmem:[%s5239_s5 + $0x6ec] ss:$16 sps:$4 sm:$0xff]  }
 0x1a9   :  { %3022 = vmatpush1.bf16.msra.mxu1 %v3797_v6  ;;  %2859 = vmatprep.subr.bf16.mxu0 %v3802_v7  ;;  %v3878_v6 = vld [vmem:[%s5239_s5 + $0x6e0] ss:$16 sps:$4 sm:$0xff]   ;;  %v3881_v7 = vld [vmem:[%s5239_s5 + $0x6e8] ss:$16 sps:$4 sm:$0xff]  }
 0x1aa   :  { %3023 = vmatprep.subr.bf16.mxu1 %v3805_v8  ;;  %v3886_v8 = vld [vmem:[%s5239_s5 + $0x704] ss:$16 sps:$4 sm:$0xff]  }
 0x1ac   :  { %2860 = vmatpush1.bf16.msra.mxu0 %v3800_v9  ;;  %v3889_v9 = vld [vmem:[%s5239_s5 + $0x70c] ss:$16 sps:$4 sm:$0xff]  }
 0x1ad   :  { %3024 = vmatpush1.bf16.msra.mxu1 %v3803_v10  ;;  %2861 = vmatprep.subr.bf16.mxu0 %v3808_v11  ;;  %v3884_v10 = vld [vmem:[%s5239_s5 + $0x700] ss:$16 sps:$4 sm:$0xff]   ;;  %v3887_v11 = vld [vmem:[%s5239_s5 + $0x708] ss:$16 sps:$4 sm:$0xff]  }
 0x1ae   :  { %3025 = vmatprep.subr.bf16.mxu1 %v3811_v13  ;;  %v3892_v13 = vld [vmem:[%s5239_s5 + $0x724] ss:$16 sps:$4 sm:$0xff]  }
 0x1b0   :  { %2862 = vmatpush1.bf16.msra.mxu0 %v3806_v14  ;;  %v3895_v14 = vld [vmem:[%s5239_s5 + $0x72c] ss:$16 sps:$4 sm:$0xff]  }
 0x1b1   :  { %3026 = vmatpush1.bf16.msra.mxu1 %v3809_v15  ;;  %2863 = vmatprep.subr.bf16.mxu0 %v3814_v20  ;;  %v3890_v15 = vld [vmem:[%s5239_s5 + $0x720] ss:$16 sps:$4 sm:$0xff]   ;;  %v3893_v20 = vld [vmem:[%s5239_s5 + $0x728] ss:$16 sps:$4 sm:$0xff]  }
 0x1b2   :  { %3027 = vmatprep.subr.bf16.mxu1 %v3817_v21  ;;  %v3898_v21 = vld [vmem:[%s5239_s5 + $0x744] ss:$16 sps:$4 sm:$0xff]  }
 0x1b4   :  { %2864 = vmatpush1.bf16.msra.mxu0 %v3812_v22  ;;  %v3901_v22 = vld [vmem:[%s5239_s5 + $0x74c] ss:$16 sps:$4 sm:$0xff]  }
 0x1b5   :  { %3028 = vmatpush1.bf16.msra.mxu1 %v3815_v23  ;;  %2865 = vmatprep.subr.bf16.mxu0 %v3820_v24  ;;  %v3896_v23 = vld [vmem:[%s5239_s5 + $0x740] ss:$16 sps:$4 sm:$0xff]   ;;  %v3899_v24 = vld [vmem:[%s5239_s5 + $0x748] ss:$16 sps:$4 sm:$0xff]  }
 0x1b6   :  { %3029 = vmatprep.subr.bf16.mxu1 %v3823_v25  ;;  %v3904_v25 = vld [vmem:[%s5239_s5 + $0x764] ss:$16 sps:$4 sm:$0xff]  }
 0x1b8   :  { %2866 = vmatpush1.bf16.msra.mxu0 %v3818_v26  ;;  %v3907_v26 = vld [vmem:[%s5239_s5 + $0x76c] ss:$16 sps:$4 sm:$0xff]  }
 0x1b9   :  { %3030 = vmatpush1.bf16.msra.mxu1 %v3821_v27  ;;  %2867 = vmatprep.subr.bf16.mxu0 %v3826_v30  ;;  %v3902_v27 = vld [vmem:[%s5239_s5 + $0x760] ss:$16 sps:$4 sm:$0xff]   ;;  %v3905_v30 = vld [vmem:[%s5239_s5 + $0x768] ss:$16 sps:$4 sm:$0xff]  }
 0x1ba   :  { %3031 = vmatprep.subr.bf16.mxu1 %v3829_v32  ;;  %v3910_v32 = vld [vmem:[%s5239_s5 + $0x784] ss:$16 sps:$4 sm:$0xff]  }
 0x1bc   :  { %2868 = vmatpush1.bf16.msra.mxu0 %v3824_v33  ;;  %v3913_v33 = vld [vmem:[%s5239_s5 + $0x78c] ss:$16 sps:$4 sm:$0xff]  }
 0x1bd   :  { %3032 = vmatpush1.bf16.msra.mxu1 %v3827_v54  ;;  %2869 = vmatprep.subr.bf16.mxu0 %v3832_v34  ;;  %v3908_v54 = vld [vmem:[%s5239_s5 + $0x780] ss:$16 sps:$4 sm:$0xff]   ;;  %v3911_v34 = vld [vmem:[%s5239_s5 + $0x788] ss:$16 sps:$4 sm:$0xff]  }
 0x1be   :  { %3033 = vmatprep.subr.bf16.mxu1 %v3835_v38  ;;  %v3916_v38 = vld [vmem:[%s5239_s5 + $0x7a4] ss:$16 sps:$4 sm:$0xff]  }
 0x1c0   :  { %2870 = vmatpush1.bf16.msra.mxu0 %v3830_v39  ;;  %v3919_v39 = vld [vmem:[%s5239_s5 + $0x7ac] ss:$16 sps:$4 sm:$0xff]  }
 0x1c1   :  { %3034 = vmatpush1.bf16.msra.mxu1 %v3833_v41  ;;  %2880 = vmatprep.subr.bf16.mxu0 %v3838_v42  ;;  %v3917_v41 = vld [vmem:[%s5239_s5 + $0x7a8] ss:$16 sps:$4 sm:$0xff]   ;;  %v3922_v42 = vld [vmem:[%s5239_s5 + $0x7c4] ss:$16 sps:$4 sm:$0xff]  }
 0x1c2   :  { %3044 = vmatprep.subr.bf16.mxu1 %v3841_v43  ;;  %v3925_v43 = vld [vmem:[%s5239_s5 + $0x7cc] ss:$16 sps:$4 sm:$0xff]  }
 0x1c3   :  { %2872 = vmatmul.mubr.bf16.vlgmr.msra.gmra.mrb[16].mxu0 %v1195_v45 }
 0x1c4   :  { %3036 = vmatmul.mubr.bf16.vlgmr.msra.gmra.mrb[16].mxu1 %v1195_v45  ;;  %2881 = vmatpush1.bf16.msra.mxu0 %v3836_v28  ;;  %v3923_v28 = vld [vmem:[%s5239_s5 + $0x7c8] ss:$16 sps:$4 sm:$0xff]   ;;  %v3928_v45 = vld [vmem:[%s5239_s5 + $0x7e4] ss:$16 sps:$4 sm:$0xff]  }
 0x1c5   :  { %2912 = vmatprep.mubr.bf16.mxu0 %v1198_v48  ;;  %3045 = vmatpush1.bf16.msra.mxu1 %v3839_v46  ;;  %v3931_v46 = vld [vmem:[%s5239_s5 + $0x7ec] ss:$16 sps:$4 sm:$0xff]  }
 0x1c6   :  { %3076 = vmatprep.mubr.bf16.mxu1 %v1198_v48  ;;  %2882 = vmatprep.subr.bf16.mxu0 %v3844_v47  ;;  %v3926_v47 = vld [vmem:[%s5239_s5 + $0x7e0] ss:$16 sps:$4 sm:$0xff]   ;;  %v1189_v48 = vmax.f32 %v4716_v51, 0.0 }
 0x1c7   :  { %3046 = vmatprep.subr.bf16.mxu1 %v3847_v31  ;;  %v3929_v31 = vld [vmem:[%s5239_s5 + $0x7e8] ss:$16 sps:$4 sm:$0xff]   ;;  %v1455_v51 = vld [vmem:[%s5242_s6] sm:$0xf] }
 0x1c8   :  { %2883 = vmatpush1.bf16.msra.mxu0 %v3842_v49  ;;  %v1197_v49 = vpack.c.bf16 %v1189_v48, %v1189_v48 }
 0x1c9   :  { %3047 = vmatpush1.bf16.msra.mxu1 %v3845_v50  ;;  %2884 = vmatprep.subr.bf16.mxu0 %v3850_v52  ;;  %v14_v50 = vstv %s5241_s8  ;;  %v1460_v52 = vrot.slane %v1455_v51, %v4610_v35 }
 0x1ca   :  { %3048 = vmatprep.subr.bf16.mxu1 %v3853_v12  ;;  %15 = vst [vmem:[#allocation2] sm:$0x1] %v14_v50  ;;  %v3089_v12 = vld [vmem:[%s5243_s7] sm:$0xf] }
 0x1cc   :  { %2885 = vmatpush1.bf16.msra.mxu0 %v3848_v16  ;;  %v1468_v16 = vrot.slane %v1455_v51, %v4612_v36 }
 0x1cd   :  { %3049 = vmatpush1.bf16.msra.mxu1 %v3851_v29  ;;  %2886 = vmatprep.subr.bf16.mxu0 %v3856_v17  ;;  %v1464_v29 = vrot.slane %v1455_v51, %v4614_v37  ;;  %v1472_v17 = vrot.slane %v1455_v51, %v4616_v3 }
 0x1ce   :  { %3050 = vmatprep.subr.bf16.mxu1 %v3859_v18 }
 0x1d0   :  { %2887 = vmatpush1.bf16.msra.mxu0 %v3854_v53 }
 0x1d1   :  { %3051 = vmatpush1.bf16.msra.mxu1 %v3857_v19  ;;  %2888 = vmatprep.subr.bf16.mxu0 %v3862_v55  ;;  %v3094_v19 = vrot.slane %v3089_v12, %v4610_v35 }
 0x1d2   :  { %3052 = vmatprep.subr.bf16.mxu1 %v3865_v56 }
 0x1d4   :  { %2889 = vmatpush1.bf16.msra.mxu0 %v3860_v57 }
 0x1d5   :  { %3053 = vmatpush1.bf16.msra.mxu1 %v3863_v58  ;;  %2890 = vmatprep.subr.bf16.mxu0 %v3868_v59  ;;  %v3098_v59 = vrot.slane %v3089_v12, %v4614_v37 }
 0x1d6   :  { %3054 = vmatprep.subr.bf16.mxu1 %v3871_v60 }
 0x1d8   :  { %2891 = vmatpush1.bf16.msra.mxu0 %v3866_v61 }
 0x1d9   :  { %3055 = vmatpush1.bf16.msra.mxu1 %v3869_v62  ;;  %2892 = vmatprep.subr.bf16.mxu0 %v3874_v63 }
 0x1da   :  { %3056 = vmatprep.subr.bf16.mxu1 %v3877_v0 }
 0x1dc   :  { %2893 = vmatpush1.bf16.msra.mxu0 %v3872_v1 }
 0x1dd   :  { %3057 = vmatpush1.bf16.msra.mxu1 %v3875_v2  ;;  %2894 = vmatprep.subr.bf16.mxu0 %v3880_v4  ;;  %v3102_v4 = vrot.slane %v3089_v12, %v4612_v36 }
 0x1de   :  { %3058 = vmatprep.subr.bf16.mxu1 %v3883_v5 }
 0x1e0   :  { %2895 = vmatpush1.bf16.msra.mxu0 %v3878_v6 }
 0x1e1   :  { %3059 = vmatpush1.bf16.msra.mxu1 %v3881_v7  ;;  %2896 = vmatprep.subr.bf16.mxu0 %v3886_v8 }
 0x1e2   :  { %3060 = vmatprep.subr.bf16.mxu1 %v3889_v9  ;;  %v3106_v9 = vrot.slane %v3089_v12, %v4616_v3 }
 0x1e4   :  { %2897 = vmatpush1.bf16.msra.mxu0 %v3884_v10 }
 0x1e5   :  { %3061 = vmatpush1.bf16.msra.mxu1 %v3887_v11  ;;  %2898 = vmatprep.subr.bf16.mxu0 %v3892_v13 }
 0x1e6   :  { %3062 = vmatprep.subr.bf16.mxu1 %v3895_v14 }
 0x1e8   :  { %2899 = vmatpush1.bf16.msra.mxu0 %v3890_v15  ;;  %v3518_v15 = vld [vmem:[#allocation2] ss:$0 sm:$0xff] }
 0x1e9   :  { %3063 = vmatpush1.bf16.msra.mxu1 %v3893_v20  ;;  %2900 = vmatprep.subr.bf16.mxu0 %v3898_v21 }
 0x1ea   :  { %3064 = vmatprep.subr.bf16.mxu1 %v3901_v22 }
 0x1ec   :  { %2901 = vmatpush1.bf16.msra.mxu0 %v3896_v23 }
 0x1ed   :  { %3065 = vmatpush1.bf16.msra.mxu1 %v3899_v24  ;;  %2902 = vmatprep.subr.bf16.mxu0 %v3904_v25 }
 0x1ee   :  { %3066 = vmatprep.subr.bf16.mxu1 %v3907_v26 }
 0x1f0   :  { %2903 = vmatpush1.bf16.msra.mxu0 %v3902_v27 }
 0x1f1   :  { %3067 = vmatpush1.bf16.msra.mxu1 %v3905_v30  ;;  %2904 = vmatprep.subr.bf16.mxu0 %v3910_v32 }
 0x1f2   :  { %3068 = vmatprep.subr.bf16.mxu1 %v3913_v33 }
 0x1f4   :  { %2905 = vmatpush1.bf16.msra.mxu0 %v3908_v54 }
 0x1f5   :  { %3069 = vmatpush1.bf16.msra.mxu1 %v3911_v34  ;;  %2906 = vmatprep.subr.bf16.mxu0 %v3916_v38 }
 0x1f6   :  { %3070 = vmatprep.subr.bf16.mxu1 %v3919_v39 }
 0x1f8   :  { %2907 = vmatpush1.bf16.msra.mxu0 %v3914_v40 }
 0x1f9   :  { %3071 = vmatpush1.bf16.msra.mxu1 %v3917_v41  ;;  %2908 = vmatprep.subr.bf16.mxu0 %v3922_v42 }
 0x1fa   :  { %3072 = vmatprep.subr.bf16.mxu1 %v3925_v43 }
 0x1fc   :  { %2909 = vmatpush1.bf16.msra.mxu0 %v3920_v44 }
 0x1fd   :  { %3073 = vmatpush1.bf16.msra.mxu1 %v3923_v28  ;;  %2910 = vmatprep.subr.bf16.mxu0 %v3928_v45 }
 0x1fe   :  { %3074 = vmatprep.subr.bf16.mxu1 %v3931_v46 }
 0x200   :  { %2911 = vmatpush1.bf16.msra.mxu0 %v3926_v47 }
 0x201   :  { %3075 = vmatpush1.bf16.msra.mxu1 %v3929_v31 }
 0x203   :  { %2913 = vmatmul.mubr.bf16.vlgmr.msra.gmra.mrb[16].mxu0 %v1197_v49 }
 0x204   :  { %3077 = vmatmul.mubr.bf16.vlgmr.msra.gmra.mrb[16].mxu1 %v1197_v49 }
 0x2d6   :  { %v2914_v18 = vpop.f32.mrb[16].mxu0 }
 0x2d7   :  { %v3519_v53 = vadd.f32 %v2914_v18, %v1460_v52  ;;  %v3078_v55 = vpop.f32.mrb[16].mxu1  ;;  %v2916_v56 = vpop.f32.mrb[17].mxu0 }
 0x2d8   :  { %v3521_v57 = vadd.f32 %v3078_v55, %v1468_v16  ;;  %v3520_v58 = vadd.f32 %v2916_v56, %v1464_v29  ;;  %v3080_v60 = vpop.f32.mrb[17].mxu1  ;;  %v2918_v61 = vpop.f32.mrb[18].mxu0 }
 0x2d9   :  { %v3085_v62 = vmax.f32 %v3519_v53, 0.0  ;;  %v3522_v63 = vadd.f32 %v3080_v60, %v1472_v17  ;;  %v3082_v0 = vpop.f32.mrb[18].mxu1  ;;  %v2919_v1 = vpop.f32.mrb[19].mxu0 }
 0x2da   :  { %v3087_v2 = vmax.f32 %v3521_v57, 0.0  ;;  %v3086_v5 = vmax.f32 %v3520_v58, 0.0  ;;  %v3083_v6 = vpop.f32.mrb[19].mxu1 }
 0x2db   :  { %v3111_v7 = vmul.f32 %v3094_v19, %v3085_v62  ;;  %v3088_v35 = vmax.f32 %v3522_v63, 0.0 }
 0x2dc   :  { %v3112_v8 = vmul.f32 %v3098_v59, %v3086_v5  ;;  %v3113_v10 = vmul.f32 %v3102_v4, %v3087_v2 }
 0x2dd   :  { %v3114_v13 = vmul.f32 %v3106_v9, %v3088_v35 }
 0x2de   :  { %v3115_v11 = vadd.f32 %v3112_v8, %v3111_v7 }
 0x2e0   :  { %v3116_v37 = vadd.f32 %v3115_v11, %v3113_v10 }
 0x2e2   :  { %v3117_v14 = vadd.f32 %v3116_v37, %v3114_v13 }
 0x2e4   :  { %3118 = vadd.xlane.f32.xlu0 %v3117_v14 }
 0x371   :  { %v3119_v20 = vpop.xlane.xlu0 %3118 }
 0x372   :  { %v3127_v21 = vadd.f32 %v3518_v15, %v3119_v20 }
 0x374   :  { %3129 = vst.msk [vmem:[%s5244_s9] sm:$0xff] %vm3128_vm0, %v3127_v21 }

</bundles_post_ra>
